<compile_context>
chip_gen: v6e
topology: v6e:2x2x1
jax: 0.10.0
libtpu: 0.0.40
codegen_flags: <defaults>
</compile_context>

<pallas_src>
import jax
import jax.numpy as jnp
from jax.experimental import pallas as pl
from jax.experimental.pallas import tpu as pltpu


VMEM_SPEC = pl.BlockSpec(memory_space=pltpu.MemorySpace.VMEM)


# ----------------------------- fused kernel --------------------------------

def fused_forward_kernel(ids_ref, tab_ref, bconv_ref,
                         wih_bi_ref, whh_bi_ref, bbi_ref,
                         wih_uni_ref, whh_uni_ref, buni_ref,
                         wlin_ref, blin_ref, o_ref):
    # layout: ids_ref (F, B*S, 1) int32 (F row-shifted copies of flat ids)
    #         tab_ref (F*Vp, H) = stacked per-tap (emb @ conv_w_k) tables
    #         bconv_ref (1, H)
    #         wih_bi_ref (H, 8Hh), whh_bi_ref (2Hh, 8Hh), bbi_ref (1, 8Hh)
    #         wih_uni_ref (H, 4H), whh_uni_ref (H, 4H), buni_ref (1, 4H)
    #         wlin_ref (H, 1), blin_ref (1, 1), o_ref (B, 1)
    f32 = jnp.float32
    F, BS, _ = ids_ref.shape
    FVp, H = tab_ref.shape
    Vp = FVp // F
    T = o_ref.shape[0]              # scan axis = original batch B
    S = BS // T                     # padded rows per scan step (= seq_len)
    L = S - F + 1                   # valid rows (conv output length)
    Hh = H // 2
    G2 = 2 * Hh                     # per-gate block width in the packed bi layout
    G8 = 8 * Hh                     # total packed bi gate width (= 4H)

    # ---- embedding + Conv1d + bias + ReLU as ONE one-hot matmul ----------
    # conv[t, l, h] = sum_k (emb @ Wconv_k)[ids_flat[t*S + l + k], h] + b
    col_v = jax.lax.broadcasted_iota(jnp.int32, (BS, Vp), 1)
    oh = jnp.concatenate(
        [jnp.where(col_v == ids_ref[k], 1.0, 0.0).astype(f32) for k in range(F)],
        axis=1)                                                   # (BS, F*Vp)
    x_conv = jnp.maximum(
        jnp.dot(oh, tab_ref[...], preferred_element_type=f32) + bconv_ref[...],
        0.0)                                                      # (BS, H)
    # TODO(synk): nn.Dropout is identity in eval mode; training dropout not modeled.
    x_blk = [x_conv[t * S:(t + 1) * S, :] for t in range(T)]      # aligned (S, H)

    # ---- bi-LSTM: batched, hoisted input projection (one matmul) ---------
    gxb_all = (jnp.dot(x_conv, wih_bi_ref[...], preferred_element_type=f32)
               + bbi_ref[...])                                    # (BS, 8Hh)
    gxb = [gxb_all[t * S:(t + 1) * S, :] for t in range(T)]

    col_g = jax.lax.broadcasted_iota(jnp.int32, (S, G8), 1)
    fwd_cols = jnp.zeros((S, G8), jnp.bool_)                      # fwd-direction lanes
    for q in range(4):
        lo = q * G2
        fwd_cols = fwd_cols | ((col_g >= lo) & (col_g < lo + Hh))
    g_blk = (col_g >= 2 * G2) & (col_g < 3 * G2)                  # "g" gate -> plain tanh
    off_bi = jnp.where(g_blk, 0.0, 0.5).astype(f32)
    amp_bi = jnp.where(g_blk, 1.0, 0.5).astype(f32)

    # direction select hoisted out of the recurrence (no dependence on h/c)
    gx_sel = [jnp.where(fwd_cols, gxb[s], gxb[T - 1 - s]) for s in range(T)]

    # fused fwd+bwd recurrence; ONE tanh over the 128-lane gate slab per step
    # (sigmoid(x) = 0.5 + 0.5*tanh(x/2); the x/2 is pre-folded into the packed
    # i/f/o weight columns and bias).
    whh_bi = whh_bi_ref[...]
    h = jnp.zeros((S, G2), f32)                                   # [h_fwd | h_bwd]
    c = jnp.zeros((S, G2), f32)
    h_steps = [None] * T
    for s in range(T):                      # unrolled; T = batch, small & static
        g = gx_sel[s] + jnp.dot(h, whh_bi, preferred_element_type=f32)
        a = off_bi + amp_bi * jnp.tanh(g)
        i_g = a[:, 0:G2]
        f_g = a[:, G2:2 * G2]
        g_g = a[:, 2 * G2:3 * G2]
        o_g = a[:, 3 * G2:4 * G2]
        c = f_g * c + i_g * g_g
        h = o_g * jnp.tanh(c)
        h_steps[s] = h                      # [fwd Hh | bwd Hh]

    # ---- uni-LSTM on (bi_out + residual), head fused in its epilogue -----
    # bi_out[t] = [fwd half of h_steps[t] | bwd half of h_steps[T-1-t]]:
    # full-width select, no lane-16 slice + concat.
    lane_h = jax.lax.broadcasted_iota(jnp.int32, (S, G2), 1)
    first_half = lane_h < Hh
    uni_in = [jnp.where(first_half, h_steps[t], h_steps[T - 1 - t]) + x_blk[t]
              for t in range(T)]
    uni_slab = jnp.concatenate(uni_in, axis=0)                    # (BS, H), aligned
    gxu_all = (jnp.dot(uni_slab, wih_uni_ref[...], preferred_element_type=f32)
               + buni_ref[...])                                   # (BS, 4H)
    gxu = [gxu_all[t * S:(t + 1) * S, :] for t in range(T)]

    col_u = jax.lax.broadcasted_iota(jnp.int32, (S, 4 * H), 1)
    g_blk_u = (col_u >= 2 * H) & (col_u < 3 * H)
    off_u = jnp.where(g_blk_u, 0.0, 0.5).astype(f32)
    amp_u = jnp.where(g_blk_u, 1.0, 0.5).astype(f32)
    row_i = jax.lax.broadcasted_iota(jnp.int32, (S, H), 0)
    valid_rows = row_i < L                                        # mask padded rows
    neg_inf = jnp.full((S, H), -jnp.inf, f32)

    whh_uni = whh_uni_ref[...]
    hu = jnp.zeros((S, H), f32)
    cu = jnp.zeros((S, H), f32)
    mvals = [None] * T
    for t in range(T):
        g = gxu[t] + jnp.dot(hu, whh_uni, preferred_element_type=f32)
        a = off_u + amp_u * jnp.tanh(g)
        i_g = a[:, 0:H]
        f_g = a[:, H:2 * H]
        g_g = a[:, 2 * H:3 * H]
        o_g = a[:, 3 * H:4 * H]
        cu = f_g * cu + i_g * g_g
        hu = o_g * jnp.tanh(cu)
        # torch.max over dim 0 (= L) of the (L,B,H) tensor == max over valid rows
        mvals[t] = jnp.max(jnp.where(valid_rows, hu, neg_inf),
                           axis=0, keepdims=True)                 # (1, H)

    m = jnp.concatenate(mvals, axis=0)                            # (B, H)
    y = jnp.dot(m, wlin_ref[...], preferred_element_type=f32) + blin_ref[...]
    o_ref[...] = jax.nn.sigmoid(y)                                # (B, 1)


# ----------------------------- weight packing -------------------------------

def _pack_bi_ih(w_f, w_b):
    # w_f, w_b: (4*Hh, H) PyTorch row order [i;f;g;o] -> (H, 8*Hh) columns
    # [i|f|g|o] blocks, each block = [fwd Hh | bwd Hh].
    Hh = w_f.shape[0] // 4
    wf_t, wb_t = w_f.T, w_b.T
    blocks = []
    for k in range(4):
        blocks.append(wf_t[:, k * Hh:(k + 1) * Hh])
        blocks.append(wb_t[:, k * Hh:(k + 1) * Hh])
    return jnp.concatenate(blocks, axis=1)


def _pack_bi_hh(w_f, w_b):
    # w_f, w_b: (4*Hh, Hh) -> block-diagonal (2*Hh, 8*Hh): rows 0:Hh = fwd h,
    # rows Hh:2Hh = bwd h; fwd h only feeds fwd gate columns and vice versa.
    Hh = w_f.shape[1]
    wf_t, wb_t = w_f.T, w_b.T
    z = jnp.zeros((Hh, Hh), wf_t.dtype)
    blocks = []
    for k in range(4):
        fwd = jnp.concatenate([wf_t[:, k * Hh:(k + 1) * Hh], z], axis=0)
        bwd = jnp.concatenate([z, wb_t[:, k * Hh:(k + 1) * Hh]], axis=0)
        blocks.append(jnp.concatenate([fwd, bwd], axis=1))
    return jnp.concatenate(blocks, axis=1)


def _pack_bi_bias(b_f, b_b):
    # b_f, b_b: (4*Hh,) (already b_ih + b_hh per direction) -> (1, 8*Hh)
    Hh = b_f.shape[0] // 4
    parts = []
    for k in range(4):
        parts.append(b_f[k * Hh:(k + 1) * Hh])
        parts.append(b_b[k * Hh:(k + 1) * Hh])
    return jnp.concatenate(parts)[None, :]


def _gate_prescale(n_cols, g_lo, g_hi):
    # 0.5 on sigmoid (i/f/o) columns, 1.0 on the tanh "g" block:
    # sigmoid(x) = 0.5 + 0.5*tanh(0.5*x); the 0.5*x is folded into the weights
    # so the kernel needs a single tanh per recurrent step.
    col = jnp.arange(n_cols)
    return jnp.where((col >= g_lo) & (col < g_hi), 1.0, 0.5
                     ).astype(jnp.float32)[None, :]


# ----------------------------- wrapper --------------------------------------

def baseline_forward(ids, params, filter_size):
    # ids: (S, B) int32 token ids (PyTorch convention: (seq_len, batch)).
    S, B = ids.shape
    F = filter_size
    H, E, _ = params['conv_w'].shape
    V = params['emb'].shape[0]
    Vp = ((V + 127) // 128) * 128
    Hh = H // 2

    # tiny integer glue: flatten ids to rows ordered (b, s) and build the F
    # row-shifted copies consumed by the in-kernel fused embedding+conv matmul.
    ids_flat = ids.astype(jnp.int32).T.reshape(-1)                # (B*S,)
    ids_shift = jnp.stack([jnp.roll(ids_flat, -k) for k in range(F)],
                          axis=0)[:, :, None]                     # (F, B*S, 1)

    # fused (embedding @ conv-tap) tables, vocab padded to a lane multiple
    emb_p = jnp.zeros((Vp, E), jnp.float32).at[:V].set(
        params['emb'].astype(jnp.float32))
    conv_tab = jnp.concatenate(
        [emb_p @ params['conv_w'][:, :, k].T for k in range(F)], axis=0)  # (F*Vp, H)
    bconv = params['conv_b'].reshape(1, H)

    # packed LSTM weights with the 0.5 sigmoid pre-scale folded into i/f/o cols
    sc_bi = _gate_prescale(8 * Hh, 4 * Hh, 6 * Hh)
    wih_bi = _pack_bi_ih(params['bi_f_w_ih'], params['bi_b_w_ih']) * sc_bi
    whh_bi = _pack_bi_hh(params['bi_f_w_hh'], params['bi_b_w_hh']) * sc_bi
    bbi = _pack_bi_bias(params['bi_f_b_ih'] + params['bi_f_b_hh'],
                        params['bi_b_b_ih'] + params['bi_b_b_hh']) * sc_bi

    sc_u = _gate_prescale(4 * H, 2 * H, 3 * H)
    wih_uni = params['uni_w_ih'].T * sc_u                         # (H, 4H)
    whh_uni = params['uni_w_hh'].T * sc_u                         # (H, 4H)
    buni = (params['uni_b_ih'] + params['uni_b_hh']).reshape(1, 4 * H) * sc_u

    wlin = params['lin_w'].T                                      # (H, 1)
    blin = params['lin_b'].reshape(1, 1)

    out = pl.pallas_call(
        fused_forward_kernel,
        out_shape=jax.ShapeDtypeStruct((B, 1), jnp.float32),
        in_specs=[VMEM_SPEC] * 11,
        out_specs=VMEM_SPEC,
    )(ids_shift, conv_tab, bconv, wih_bi, whh_bi, bbi,
      wih_uni, whh_uni, buni, wlin, blin)
    return out[:, 0]                                              # (B,)


# ----------------------------- pure-JAX reference ---------------------------

def _lstm_ref(x_tm, w_ih, w_hh, b_ih, b_hh):
    T, N, _ = x_tm.shape
    Hh = w_hh.shape[1]
    h = jnp.zeros((N, Hh), jnp.float32)
    c = jnp.zeros((N, Hh), jnp.float32)
    outs = []
    for t in range(T):
        gates = x_tm[t] @ w_ih.T + h @ w_hh.T + b_ih + b_hh
        i = jax.nn.sigmoid(gates[:, 0 * Hh:1 * Hh])
        f = jax.nn.sigmoid(gates[:, 1 * Hh:2 * Hh])
        g = jnp.tanh(gates[:, 2 * Hh:3 * Hh])
        o = jax.nn.sigmoid(gates[:, 3 * Hh:4 * Hh])
        c = f * c + i * g
        h = o * jnp.tanh(c)
        outs.append(h)
    return jnp.stack(outs, axis=0)


def baseline_reference(ids, params, filter_size):
    S, B = ids.shape
    F = filter_size
    L = S - F + 1
    emb = params['emb'][ids]                                      # (S, B, E)
    conv_in = jnp.transpose(emb, (1, 2, 0))                       # (B, E, S)
    cols = [jnp.einsum('bef,hef->bh', conv_in[:, :, t:t + F], params['conv_w'])
            for t in range(L)]
    x = jnp.stack(cols, axis=1) + params['conv_b']                # (B, L, H)
    x = jnp.maximum(x, 0.0)
    x_res = x
    bi_f = _lstm_ref(x, params['bi_f_w_ih'], params['bi_f_w_hh'],
                     params['bi_f_b_ih'], params['bi_f_b_hh'])
    bi_b = _lstm_ref(x[::-1], params['bi_b_w_ih'], params['bi_b_w_hh'],
                     params['bi_b_b_ih'], params['bi_b_b_hh'])[::-1]
    bi = jnp.concatenate([bi_f, bi_b], axis=-1)
    uni = _lstm_ref(bi + x_res, params['uni_w_ih'], params['uni_w_hh'],
                    params['uni_b_ih'], params['uni_b_hh'])
    m = jnp.max(uni, axis=1)                                      # (B, H)
    y = m @ params['lin_w'].T + params['lin_b']
    return jax.nn.sigmoid(y).squeeze(-1)


# ----------------------------- params ---------------------------------------

def init_params(key, vocab_size, embedding_dim, hidden_dim, filter_size):
    V, E, H, F = vocab_size, embedding_dim, hidden_dim, filter_size
    Hh = H // 2
    keys = jax.random.split(key, 16)
    s = 0.1

    def rnd(k, shape):
        return jax.random.normal(k, shape, jnp.float32) * s

    emb = rnd(keys[0], (V, E)).at[0].set(0.0)                     # padding_idx=0
    return dict(
        emb=emb,
        conv_w=rnd(keys[1], (H, E, F)),
        conv_b=rnd(keys[2], (H,)),
        bi_f_w_ih=rnd(keys[3], (4 * Hh, H)),
        bi_f_w_hh=rnd(keys[4], (4 * Hh, Hh)),
        bi_f_b_ih=rnd(keys[5], (4 * Hh,)),
        bi_f_b_hh=rnd(keys[6], (4 * Hh,)),
        bi_b_w_ih=rnd(keys[7], (4 * Hh, H)),
        bi_b_w_hh=rnd(keys[8], (4 * Hh, Hh)),
        bi_b_b_ih=rnd(keys[9], (4 * Hh,)),
        bi_b_b_hh=rnd(keys[10], (4 * Hh,)),
        uni_w_ih=rnd(keys[11], (4 * H, H)),
        uni_w_hh=rnd(keys[12], (4 * H, H)),
        uni_b_ih=rnd(keys[13], (4 * H,)),
        uni_b_hh=rnd(keys[14], (4 * H,)),
        lin_w=rnd(keys[15], (1, H)),
        lin_b=jnp.zeros((1,), jnp.float32),
    )


if __name__ == "__main__":
    hidden_dim, filter_size, vocab_size, embedding_dim = 32, 3, 50, 32
    seq_len, batch = 16, 4

    key = jax.random.PRNGKey(0)
    k_ids, k_params = jax.random.split(key)
    params = init_params(k_params, vocab_size, embedding_dim, hidden_dim,
                         filter_size)
    ids = jax.random.randint(k_ids, (seq_len, batch), 0, vocab_size,
                             dtype=jnp.int32)

    fwd = jax.jit(baseline_forward, static_argnums=(2,))
    out = jax.block_until_ready(fwd(ids, params, filter_size))
    assert out.shape == (batch,), out.shape
    assert bool(jnp.all(jnp.isfinite(out)))

    # validate the fused kernel against a pure-JAX f32 reference
    ref = jax.block_until_ready(baseline_reference(ids, params, filter_size))
    assert bool(jnp.allclose(out, ref, rtol=1e-4, atol=1e-4)), (out, ref)

    print("KERNEL_OK")
</pallas_src>

<mosaic_0001>
module attributes {stable_mosaic.version = 11 : i64} {
  func.func @fused_forward_kernel(%arg0: memref<3x64x1xi32, #tpu.memory_space<vmem>>, %arg1: memref<384x32xf32, #tpu.memory_space<vmem>>, %arg2: memref<1x32xf32, #tpu.memory_space<vmem>>, %arg3: memref<32x128xf32, #tpu.memory_space<vmem>>, %arg4: memref<32x128xf32, #tpu.memory_space<vmem>>, %arg5: memref<1x128xf32, #tpu.memory_space<vmem>>, %arg6: memref<32x128xf32, #tpu.memory_space<vmem>>, %arg7: memref<32x128xf32, #tpu.memory_space<vmem>>, %arg8: memref<1x128xf32, #tpu.memory_space<vmem>>, %arg9: memref<32x1xf32, #tpu.memory_space<vmem>>, %arg10: memref<1x1xf32, #tpu.memory_space<vmem>>, %arg11: memref<4x1xf32, #tpu.memory_space<vmem>>) attributes {dimension_semantics = [], scalar_prefetch = 0 : i64, scratch_operands = 0 : i64, tpu.core_type = #tpu.core_type<tc>} {
    %0 = tpu.iota {dimensions = array<i32: 1>} : vector<64x128xi32>
    %c0 = arith.constant 0 : index
    %c0_0 = arith.constant 0 : index
    %c0_1 = arith.constant 0 : index
    %1 = vector.load %arg0[%c0, %c0_0, %c0_1] : memref<3x64x1xi32, #tpu.memory_space<vmem>>, vector<1x64x1xi32>
    %2 = vector.shape_cast %1 : vector<1x64x1xi32> to vector<64x1xi32>
    %3 = vector.broadcast %2 : vector<64x1xi32> to vector<64x128xi32>
    %4 = arith.cmpi eq, %0, %3 : vector<64x128xi32>
    %cst = arith.constant 1.000000e+00 : f32
    %cst_2 = arith.constant 0.000000e+00 : f32
    %5 = vector.broadcast %cst : f32 to vector<64x128xf32>
    %6 = vector.broadcast %cst_2 : f32 to vector<64x128xf32>
    %7 = arith.select %4, %5, %6 : vector<64x128xi1>, vector<64x128xf32>
    %c1 = arith.constant 1 : index
    %c0_3 = arith.constant 0 : index
    %c0_4 = arith.constant 0 : index
    %8 = vector.load %arg0[%c1, %c0_3, %c0_4] : memref<3x64x1xi32, #tpu.memory_space<vmem>>, vector<1x64x1xi32>
    %9 = vector.shape_cast %8 : vector<1x64x1xi32> to vector<64x1xi32>
    %10 = vector.broadcast %9 : vector<64x1xi32> to vector<64x128xi32>
    %11 = arith.cmpi eq, %0, %10 : vector<64x128xi32>
    %cst_5 = arith.constant 1.000000e+00 : f32
    %cst_6 = arith.constant 0.000000e+00 : f32
    %12 = vector.broadcast %cst_5 : f32 to vector<64x128xf32>
    %13 = vector.broadcast %cst_6 : f32 to vector<64x128xf32>
    %14 = arith.select %11, %12, %13 : vector<64x128xi1>, vector<64x128xf32>
    %c2 = arith.constant 2 : index
    %c0_7 = arith.constant 0 : index
    %c0_8 = arith.constant 0 : index
    %15 = vector.load %arg0[%c2, %c0_7, %c0_8] : memref<3x64x1xi32, #tpu.memory_space<vmem>>, vector<1x64x1xi32>
    %16 = vector.shape_cast %15 : vector<1x64x1xi32> to vector<64x1xi32>
    %17 = vector.broadcast %16 : vector<64x1xi32> to vector<64x128xi32>
    %18 = arith.cmpi eq, %0, %17 : vector<64x128xi32>
    %cst_9 = arith.constant 1.000000e+00 : f32
    %cst_10 = arith.constant 0.000000e+00 : f32
    %19 = vector.broadcast %cst_9 : f32 to vector<64x128xf32>
    %20 = vector.broadcast %cst_10 : f32 to vector<64x128xf32>
    %21 = arith.select %18, %19, %20 : vector<64x128xi1>, vector<64x128xf32>
    %22 = tpu.concatenate %7, %14, %21 in 1 : vector<64x128xf32>, vector<64x128xf32>, vector<64x128xf32> -> vector<64x384xf32>
    %c0_11 = arith.constant 0 : index
    %c0_12 = arith.constant 0 : index
    %23 = vector.load %arg1[%c0_11, %c0_12] : memref<384x32xf32, #tpu.memory_space<vmem>>, vector<384x32xf32>
    %cst_13 = arith.constant dense<0.000000e+00> : vector<64x32xf32>
    %24 = tpu.matmul %22, %23, %cst_13 {dimension_numbers = #tpu.dot_dimension_numbers<[1], [0], [0], [1], [0, 0, 1, 1], [], []>} : vector<64x384xf32>, vector<384x32xf32>, vector<64x32xf32> -> vector<64x32xf32>
    %c0_14 = arith.constant 0 : index
    %c0_15 = arith.constant 0 : index
    %25 = vector.load %arg2[%c0_14, %c0_15] : memref<1x32xf32, #tpu.memory_space<vmem>>, vector<1x32xf32>
    %26 = vector.broadcast %25 : vector<1x32xf32> to vector<64x32xf32>
    %27 = arith.addf %24, %26 : vector<64x32xf32>
    %cst_16 = arith.constant 0.000000e+00 : f32
    %28 = vector.broadcast %cst_16 : f32 to vector<64x32xf32>
    %29 = arith.maximumf %27, %28 : vector<64x32xf32>
    %30 = vector.extract_strided_slice %29 {offsets = [0, 0], sizes = [16, 32], strides = [1, 1]} : vector<64x32xf32> to vector<16x32xf32>
    %31 = vector.extract_strided_slice %29 {offsets = [16, 0], sizes = [16, 32], strides = [1, 1]} : vector<64x32xf32> to vector<16x32xf32>
    %32 = vector.extract_strided_slice %29 {offsets = [32, 0], sizes = [16, 32], strides = [1, 1]} : vector<64x32xf32> to vector<16x32xf32>
    %33 = vector.extract_strided_slice %29 {offsets = [48, 0], sizes = [16, 32], strides = [1, 1]} : vector<64x32xf32> to vector<16x32xf32>
    %c0_17 = arith.constant 0 : index
    %c0_18 = arith.constant 0 : index
    %34 = vector.load %arg3[%c0_17, %c0_18] : memref<32x128xf32, #tpu.memory_space<vmem>>, vector<32x128xf32>
    %cst_19 = arith.constant dense<0.000000e+00> : vector<64x128xf32>
    %35 = tpu.matmul %29, %34, %cst_19 {dimension_numbers = #tpu.dot_dimension_numbers<[1], [0], [0], [1], [0, 0, 1, 1], [], []>} : vector<64x32xf32>, vector<32x128xf32>, vector<64x128xf32> -> vector<64x128xf32>
    %c0_20 = arith.constant 0 : index
    %c0_21 = arith.constant 0 : index
    %36 = vector.load %arg5[%c0_20, %c0_21] : memref<1x128xf32, #tpu.memory_space<vmem>>, vector<1x128xf32>
    %37 = vector.broadcast %36 : vector<1x128xf32> to vector<64x128xf32>
    %38 = arith.addf %35, %37 : vector<64x128xf32>
    %39 = vector.extract_strided_slice %38 {offsets = [0, 0], sizes = [16, 128], strides = [1, 1]} : vector<64x128xf32> to vector<16x128xf32>
    %40 = vector.extract_strided_slice %38 {offsets = [16, 0], sizes = [16, 128], strides = [1, 1]} : vector<64x128xf32> to vector<16x128xf32>
    %41 = vector.extract_strided_slice %38 {offsets = [32, 0], sizes = [16, 128], strides = [1, 1]} : vector<64x128xf32> to vector<16x128xf32>
    %42 = vector.extract_strided_slice %38 {offsets = [48, 0], sizes = [16, 128], strides = [1, 1]} : vector<64x128xf32> to vector<16x128xf32>
    %43 = tpu.iota {dimensions = array<i32: 1>} : vector<16x128xi32>
    %false = arith.constant false
    %44 = vector.broadcast %false : i1 to vector<16x128xi1>
    %c0_i32 = arith.constant 0 : i32
    %45 = vector.broadcast %c0_i32 : i32 to vector<16x128xi32>
    %46 = arith.cmpi sge, %43, %45 : vector<16x128xi32>
    %c16_i32 = arith.constant 16 : i32
    %47 = vector.broadcast %c16_i32 : i32 to vector<16x128xi32>
    %48 = arith.cmpi slt, %43, %47 : vector<16x128xi32>
    %49 = arith.andi %46, %48 : vector<16x128xi1>
    %50 = arith.ori %44, %49 : vector<16x128xi1>
    %c32_i32 = arith.constant 32 : i32
    %51 = vector.broadcast %c32_i32 : i32 to vector<16x128xi32>
    %52 = arith.cmpi sge, %43, %51 : vector<16x128xi32>
    %c48_i32 = arith.constant 48 : i32
    %53 = vector.broadcast %c48_i32 : i32 to vector<16x128xi32>
    %54 = arith.cmpi slt, %43, %53 : vector<16x128xi32>
    %55 = arith.andi %52, %54 : vector<16x128xi1>
    %56 = arith.ori %50, %55 : vector<16x128xi1>
    %c64_i32 = arith.constant 64 : i32
    %57 = vector.broadcast %c64_i32 : i32 to vector<16x128xi32>
    %58 = arith.cmpi sge, %43, %57 : vector<16x128xi32>
    %c80_i32 = arith.constant 80 : i32
    %59 = vector.broadcast %c80_i32 : i32 to vector<16x128xi32>
    %60 = arith.cmpi slt, %43, %59 : vector<16x128xi32>
    %61 = arith.andi %58, %60 : vector<16x128xi1>
    %62 = arith.ori %56, %61 : vector<16x128xi1>
    %c96_i32 = arith.constant 96 : i32
    %63 = vector.broadcast %c96_i32 : i32 to vector<16x128xi32>
    %64 = arith.cmpi sge, %43, %63 : vector<16x128xi32>
    %c112_i32 = arith.constant 112 : i32
    %65 = vector.broadcast %c112_i32 : i32 to vector<16x128xi32>
    %66 = arith.cmpi slt, %43, %65 : vector<16x128xi32>
    %67 = arith.andi %64, %66 : vector<16x128xi1>
    %68 = arith.ori %62, %67 : vector<16x128xi1>
    %c64_i32_22 = arith.constant 64 : i32
    %69 = vector.broadcast %c64_i32_22 : i32 to vector<16x128xi32>
    %70 = arith.cmpi sge, %43, %69 : vector<16x128xi32>
    %c96_i32_23 = arith.constant 96 : i32
    %71 = vector.broadcast %c96_i32_23 : i32 to vector<16x128xi32>
    %72 = arith.cmpi slt, %43, %71 : vector<16x128xi32>
    %73 = arith.andi %70, %72 : vector<16x128xi1>
    %cst_24 = arith.constant 0.000000e+00 : f32
    %cst_25 = arith.constant 5.000000e-01 : f32
    %74 = vector.broadcast %cst_24 : f32 to vector<16x128xf32>
    %75 = vector.broadcast %cst_25 : f32 to vector<16x128xf32>
    %76 = arith.select %73, %74, %75 : vector<16x128xi1>, vector<16x128xf32>
    %cst_26 = arith.constant 1.000000e+00 : f32
    %cst_27 = arith.constant 5.000000e-01 : f32
    %77 = vector.broadcast %cst_26 : f32 to vector<16x128xf32>
    %78 = vector.broadcast %cst_27 : f32 to vector<16x128xf32>
    %79 = arith.select %73, %77, %78 : vector<16x128xi1>, vector<16x128xf32>
    %80 = arith.select %68, %39, %42 : vector<16x128xi1>, vector<16x128xf32>
    %81 = arith.select %68, %40, %41 : vector<16x128xi1>, vector<16x128xf32>
    %82 = arith.select %68, %41, %40 : vector<16x128xi1>, vector<16x128xf32>
    %83 = arith.select %68, %42, %39 : vector<16x128xi1>, vector<16x128xf32>
    %c0_28 = arith.constant 0 : index
    %c0_29 = arith.constant 0 : index
    %84 = vector.load %arg4[%c0_28, %c0_29] : memref<32x128xf32, #tpu.memory_space<vmem>>, vector<32x128xf32>
    %cst_30 = arith.constant 0.000000e+00 : f32
    %85 = vector.broadcast %cst_30 : f32 to vector<16x32xf32>
    %cst_31 = arith.constant 0.000000e+00 : f32
    %86 = vector.broadcast %cst_31 : f32 to vector<16x32xf32>
    %cst_32 = arith.constant dense<0.000000e+00> : vector<16x128xf32>
    %87 = tpu.matmul %85, %84, %cst_32 {dimension_numbers = #tpu.dot_dimension_numbers<[1], [0], [0], [1], [0, 0, 1, 1], [], []>} : vector<16x32xf32>, vector<32x128xf32>, vector<16x128xf32> -> vector<16x128xf32>
    %88 = arith.addf %80, %87 : vector<16x128xf32>
    %89 = math.tanh %88 : vector<16x128xf32>
    %90 = arith.mulf %79, %89 : vector<16x128xf32>
    %91 = arith.addf %76, %90 : vector<16x128xf32>
    %92 = vector.extract_strided_slice %91 {offsets = [0, 0], sizes = [16, 32], strides = [1, 1]} : vector<16x128xf32> to vector<16x32xf32>
    %93 = vector.extract_strided_slice %91 {offsets = [0, 32], sizes = [16, 32], strides = [1, 1]} : vector<16x128xf32> to vector<16x32xf32>
    %94 = vector.extract_strided_slice %91 {offsets = [0, 64], sizes = [16, 32], strides = [1, 1]} : vector<16x128xf32> to vector<16x32xf32>
    %95 = vector.extract_strided_slice %91 {offsets = [0, 96], sizes = [16, 32], strides = [1, 1]} : vector<16x128xf32> to vector<16x32xf32>
    %96 = arith.mulf %93, %86 : vector<16x32xf32>
    %97 = arith.mulf %92, %94 : vector<16x32xf32>
    %98 = arith.addf %96, %97 : vector<16x32xf32>
    %99 = math.tanh %98 : vector<16x32xf32>
    %100 = arith.mulf %95, %99 : vector<16x32xf32>
    %cst_33 = arith.constant dense<0.000000e+00> : vector<16x128xf32>
    %101 = tpu.matmul %100, %84, %cst_33 {dimension_numbers = #tpu.dot_dimension_numbers<[1], [0], [0], [1], [0, 0, 1, 1], [], []>} : vector<16x32xf32>, vector<32x128xf32>, vector<16x128xf32> -> vector<16x128xf32>
    %102 = arith.addf %81, %101 : vector<16x128xf32>
    %103 = math.tanh %102 : vector<16x128xf32>
    %104 = arith.mulf %79, %103 : vector<16x128xf32>
    %105 = arith.addf %76, %104 : vector<16x128xf32>
    %106 = vector.extract_strided_slice %105 {offsets = [0, 0], sizes = [16, 32], strides = [1, 1]} : vector<16x128xf32> to vector<16x32xf32>
    %107 = vector.extract_strided_slice %105 {offsets = [0, 32], sizes = [16, 32], strides = [1, 1]} : vector<16x128xf32> to vector<16x32xf32>
    %108 = vector.extract_strided_slice %105 {offsets = [0, 64], sizes = [16, 32], strides = [1, 1]} : vector<16x128xf32> to vector<16x32xf32>
    %109 = vector.extract_strided_slice %105 {offsets = [0, 96], sizes = [16, 32], strides = [1, 1]} : vector<16x128xf32> to vector<16x32xf32>
    %110 = arith.mulf %107, %98 : vector<16x32xf32>
    %111 = arith.mulf %106, %108 : vector<16x32xf32>
    %112 = arith.addf %110, %111 : vector<16x32xf32>
    %113 = math.tanh %112 : vector<16x32xf32>
    %114 = arith.mulf %109, %113 : vector<16x32xf32>
    %cst_34 = arith.constant dense<0.000000e+00> : vector<16x128xf32>
    %115 = tpu.matmul %114, %84, %cst_34 {dimension_numbers = #tpu.dot_dimension_numbers<[1], [0], [0], [1], [0, 0, 1, 1], [], []>} : vector<16x32xf32>, vector<32x128xf32>, vector<16x128xf32> -> vector<16x128xf32>
    %116 = arith.addf %82, %115 : vector<16x128xf32>
    %117 = math.tanh %116 : vector<16x128xf32>
    %118 = arith.mulf %79, %117 : vector<16x128xf32>
    %119 = arith.addf %76, %118 : vector<16x128xf32>
    %120 = vector.extract_strided_slice %119 {offsets = [0, 0], sizes = [16, 32], strides = [1, 1]} : vector<16x128xf32> to vector<16x32xf32>
    %121 = vector.extract_strided_slice %119 {offsets = [0, 32], sizes = [16, 32], strides = [1, 1]} : vector<16x128xf32> to vector<16x32xf32>
    %122 = vector.extract_strided_slice %119 {offsets = [0, 64], sizes = [16, 32], strides = [1, 1]} : vector<16x128xf32> to vector<16x32xf32>
    %123 = vector.extract_strided_slice %119 {offsets = [0, 96], sizes = [16, 32], strides = [1, 1]} : vector<16x128xf32> to vector<16x32xf32>
    %124 = arith.mulf %121, %112 : vector<16x32xf32>
    %125 = arith.mulf %120, %122 : vector<16x32xf32>
    %126 = arith.addf %124, %125 : vector<16x32xf32>
    %127 = math.tanh %126 : vector<16x32xf32>
    %128 = arith.mulf %123, %127 : vector<16x32xf32>
    %cst_35 = arith.constant dense<0.000000e+00> : vector<16x128xf32>
    %129 = tpu.matmul %128, %84, %cst_35 {dimension_numbers = #tpu.dot_dimension_numbers<[1], [0], [0], [1], [0, 0, 1, 1], [], []>} : vector<16x32xf32>, vector<32x128xf32>, vector<16x128xf32> -> vector<16x128xf32>
    %130 = arith.addf %83, %129 : vector<16x128xf32>
    %131 = math.tanh %130 : vector<16x128xf32>
    %132 = arith.mulf %79, %131 : vector<16x128xf32>
    %133 = arith.addf %76, %132 : vector<16x128xf32>
    %134 = vector.extract_strided_slice %133 {offsets = [0, 0], sizes = [16, 32], strides = [1, 1]} : vector<16x128xf32> to vector<16x32xf32>
    %135 = vector.extract_strided_slice %133 {offsets = [0, 32], sizes = [16, 32], strides = [1, 1]} : vector<16x128xf32> to vector<16x32xf32>
    %136 = vector.extract_strided_slice %133 {offsets = [0, 64], sizes = [16, 32], strides = [1, 1]} : vector<16x128xf32> to vector<16x32xf32>
    %137 = vector.extract_strided_slice %133 {offsets = [0, 96], sizes = [16, 32], strides = [1, 1]} : vector<16x128xf32> to vector<16x32xf32>
    %138 = arith.mulf %135, %126 : vector<16x32xf32>
    %139 = arith.mulf %134, %136 : vector<16x32xf32>
    %140 = arith.addf %138, %139 : vector<16x32xf32>
    %141 = math.tanh %140 : vector<16x32xf32>
    %142 = arith.mulf %137, %141 : vector<16x32xf32>
    %143 = tpu.iota {dimensions = array<i32: 1>} : vector<16x32xi32>
    %c16_i32_36 = arith.constant 16 : i32
    %144 = vector.broadcast %c16_i32_36 : i32 to vector<16x32xi32>
    %145 = arith.cmpi slt, %143, %144 : vector<16x32xi32>
    %146 = arith.select %145, %100, %142 : vector<16x32xi1>, vector<16x32xf32>
    %147 = arith.addf %146, %30 : vector<16x32xf32>
    %148 = arith.select %145, %114, %128 : vector<16x32xi1>, vector<16x32xf32>
    %149 = arith.addf %148, %31 : vector<16x32xf32>
    %150 = arith.select %145, %128, %114 : vector<16x32xi1>, vector<16x32xf32>
    %151 = arith.addf %150, %32 : vector<16x32xf32>
    %152 = arith.select %145, %142, %100 : vector<16x32xi1>, vector<16x32xf32>
    %153 = arith.addf %152, %33 : vector<16x32xf32>
    %154 = tpu.concatenate %147, %149, %151, %153 in 0 : vector<16x32xf32>, vector<16x32xf32>, vector<16x32xf32>, vector<16x32xf32> -> vector<64x32xf32>
    %c0_37 = arith.constant 0 : index
    %c0_38 = arith.constant 0 : index
    %155 = vector.load %arg6[%c0_37, %c0_38] : memref<32x128xf32, #tpu.memory_space<vmem>>, vector<32x128xf32>
    %cst_39 = arith.constant dense<0.000000e+00> : vector<64x128xf32>
    %156 = tpu.matmul %154, %155, %cst_39 {dimension_numbers = #tpu.dot_dimension_numbers<[1], [0], [0], [1], [0, 0, 1, 1], [], []>} : vector<64x32xf32>, vector<32x128xf32>, vector<64x128xf32> -> vector<64x128xf32>
    %c0_40 = arith.constant 0 : index
    %c0_41 = arith.constant 0 : index
    %157 = vector.load %arg8[%c0_40, %c0_41] : memref<1x128xf32, #tpu.memory_space<vmem>>, vector<1x128xf32>
    %158 = vector.broadcast %157 : vector<1x128xf32> to vector<64x128xf32>
    %159 = arith.addf %156, %158 : vector<64x128xf32>
    %160 = vector.extract_strided_slice %159 {offsets = [0, 0], sizes = [16, 128], strides = [1, 1]} : vector<64x128xf32> to vector<16x128xf32>
    %161 = vector.extract_strided_slice %159 {offsets = [16, 0], sizes = [16, 128], strides = [1, 1]} : vector<64x128xf32> to vector<16x128xf32>
    %162 = vector.extract_strided_slice %159 {offsets = [32, 0], sizes = [16, 128], strides = [1, 1]} : vector<64x128xf32> to vector<16x128xf32>
    %163 = vector.extract_strided_slice %159 {offsets = [48, 0], sizes = [16, 128], strides = [1, 1]} : vector<64x128xf32> to vector<16x128xf32>
    %164 = tpu.iota {dimensions = array<i32: 1>} : vector<16x128xi32>
    %c64_i32_42 = arith.constant 64 : i32
    %165 = vector.broadcast %c64_i32_42 : i32 to vector<16x128xi32>
    %166 = arith.cmpi sge, %164, %165 : vector<16x128xi32>
    %c96_i32_43 = arith.constant 96 : i32
    %167 = vector.broadcast %c96_i32_43 : i32 to vector<16x128xi32>
    %168 = arith.cmpi slt, %164, %167 : vector<16x128xi32>
    %169 = arith.andi %166, %168 : vector<16x128xi1>
    %cst_44 = arith.constant 0.000000e+00 : f32
    %cst_45 = arith.constant 5.000000e-01 : f32
    %170 = vector.broadcast %cst_44 : f32 to vector<16x128xf32>
    %171 = vector.broadcast %cst_45 : f32 to vector<16x128xf32>
    %172 = arith.select %169, %170, %171 : vector<16x128xi1>, vector<16x128xf32>
    %cst_46 = arith.constant 1.000000e+00 : f32
    %cst_47 = arith.constant 5.000000e-01 : f32
    %173 = vector.broadcast %cst_46 : f32 to vector<16x128xf32>
    %174 = vector.broadcast %cst_47 : f32 to vector<16x128xf32>
    %175 = arith.select %169, %173, %174 : vector<16x128xi1>, vector<16x128xf32>
    %176 = tpu.iota {dimensions = array<i32: 0>} : vector<16x32xi32>
    %c14_i32 = arith.constant 14 : i32
    %177 = vector.broadcast %c14_i32 : i32 to vector<16x32xi32>
    %178 = arith.cmpi slt, %176, %177 : vector<16x32xi32>
    %cst_48 = arith.constant 0xFF800000 : f32
    %179 = vector.broadcast %cst_48 : f32 to vector<16x32xf32>
    %c0_49 = arith.constant 0 : index
    %c0_50 = arith.constant 0 : index
    %180 = vector.load %arg7[%c0_49, %c0_50] : memref<32x128xf32, #tpu.memory_space<vmem>>, vector<32x128xf32>
    %cst_51 = arith.constant 0.000000e+00 : f32
    %181 = vector.broadcast %cst_51 : f32 to vector<16x32xf32>
    %cst_52 = arith.constant 0.000000e+00 : f32
    %182 = vector.broadcast %cst_52 : f32 to vector<16x32xf32>
    %cst_53 = arith.constant dense<0.000000e+00> : vector<16x128xf32>
    %183 = tpu.matmul %181, %180, %cst_53 {dimension_numbers = #tpu.dot_dimension_numbers<[1], [0], [0], [1], [0, 0, 1, 1], [], []>} : vector<16x32xf32>, vector<32x128xf32>, vector<16x128xf32> -> vector<16x128xf32>
    %184 = arith.addf %160, %183 : vector<16x128xf32>
    %185 = math.tanh %184 : vector<16x128xf32>
    %186 = arith.mulf %175, %185 : vector<16x128xf32>
    %187 = arith.addf %172, %186 : vector<16x128xf32>
    %188 = vector.extract_strided_slice %187 {offsets = [0, 0], sizes = [16, 32], strides = [1, 1]} : vector<16x128xf32> to vector<16x32xf32>
    %189 = vector.extract_strided_slice %187 {offsets = [0, 32], sizes = [16, 32], strides = [1, 1]} : vector<16x128xf32> to vector<16x32xf32>
    %190 = vector.extract_strided_slice %187 {offsets = [0, 64], sizes = [16, 32], strides = [1, 1]} : vector<16x128xf32> to vector<16x32xf32>
    %191 = vector.extract_strided_slice %187 {offsets = [0, 96], sizes = [16, 32], strides = [1, 1]} : vector<16x128xf32> to vector<16x32xf32>
    %192 = arith.mulf %189, %182 : vector<16x32xf32>
    %193 = arith.mulf %188, %190 : vector<16x32xf32>
    %194 = arith.addf %192, %193 : vector<16x32xf32>
    %195 = math.tanh %194 : vector<16x32xf32>
    %196 = arith.mulf %191, %195 : vector<16x32xf32>
    %197 = arith.select %178, %196, %179 : vector<16x32xi1>, vector<16x32xf32>
    %cst_54 = arith.constant dense<0xFF800000> : vector<32xf32>
    %198 = vector.multi_reduction <maximumf>, %197, %cst_54 [0] : vector<16x32xf32> to vector<32xf32>
    %199 = vector.shape_cast %198 : vector<32xf32> to vector<1x32xf32>
    %cst_55 = arith.constant dense<0.000000e+00> : vector<16x128xf32>
    %200 = tpu.matmul %196, %180, %cst_55 {dimension_numbers = #tpu.dot_dimension_numbers<[1], [0], [0], [1], [0, 0, 1, 1], [], []>} : vector<16x32xf32>, vector<32x128xf32>, vector<16x128xf32> -> vector<16x128xf32>
    %201 = arith.addf %161, %200 : vector<16x128xf32>
    %202 = math.tanh %201 : vector<16x128xf32>
    %203 = arith.mulf %175, %202 : vector<16x128xf32>
    %204 = arith.addf %172, %203 : vector<16x128xf32>
    %205 = vector.extract_strided_slice %204 {offsets = [0, 0], sizes = [16, 32], strides = [1, 1]} : vector<16x128xf32> to vector<16x32xf32>
    %206 = vector.extract_strided_slice %204 {offsets = [0, 32], sizes = [16, 32], strides = [1, 1]} : vector<16x128xf32> to vector<16x32xf32>
    %207 = vector.extract_strided_slice %204 {offsets = [0, 64], sizes = [16, 32], strides = [1, 1]} : vector<16x128xf32> to vector<16x32xf32>
    %208 = vector.extract_strided_slice %204 {offsets = [0, 96], sizes = [16, 32], strides = [1, 1]} : vector<16x128xf32> to vector<16x32xf32>
    %209 = arith.mulf %206, %194 : vector<16x32xf32>
    %210 = arith.mulf %205, %207 : vector<16x32xf32>
    %211 = arith.addf %209, %210 : vector<16x32xf32>
    %212 = math.tanh %211 : vector<16x32xf32>
    %213 = arith.mulf %208, %212 : vector<16x32xf32>
    %214 = arith.select %178, %213, %179 : vector<16x32xi1>, vector<16x32xf32>
    %cst_56 = arith.constant dense<0xFF800000> : vector<32xf32>
    %215 = vector.multi_reduction <maximumf>, %214, %cst_56 [0] : vector<16x32xf32> to vector<32xf32>
    %216 = vector.shape_cast %215 : vector<32xf32> to vector<1x32xf32>
    %cst_57 = arith.constant dense<0.000000e+00> : vector<16x128xf32>
    %217 = tpu.matmul %213, %180, %cst_57 {dimension_numbers = #tpu.dot_dimension_numbers<[1], [0], [0], [1], [0, 0, 1, 1], [], []>} : vector<16x32xf32>, vector<32x128xf32>, vector<16x128xf32> -> vector<16x128xf32>
    %218 = arith.addf %162, %217 : vector<16x128xf32>
    %219 = math.tanh %218 : vector<16x128xf32>
    %220 = arith.mulf %175, %219 : vector<16x128xf32>
    %221 = arith.addf %172, %220 : vector<16x128xf32>
    %222 = vector.extract_strided_slice %221 {offsets = [0, 0], sizes = [16, 32], strides = [1, 1]} : vector<16x128xf32> to vector<16x32xf32>
    %223 = vector.extract_strided_slice %221 {offsets = [0, 32], sizes = [16, 32], strides = [1, 1]} : vector<16x128xf32> to vector<16x32xf32>
    %224 = vector.extract_strided_slice %221 {offsets = [0, 64], sizes = [16, 32], strides = [1, 1]} : vector<16x128xf32> to vector<16x32xf32>
    %225 = vector.extract_strided_slice %221 {offsets = [0, 96], sizes = [16, 32], strides = [1, 1]} : vector<16x128xf32> to vector<16x32xf32>
    %226 = arith.mulf %223, %211 : vector<16x32xf32>
    %227 = arith.mulf %222, %224 : vector<16x32xf32>
    %228 = arith.addf %226, %227 : vector<16x32xf32>
    %229 = math.tanh %228 : vector<16x32xf32>
    %230 = arith.mulf %225, %229 : vector<16x32xf32>
    %231 = arith.select %178, %230, %179 : vector<16x32xi1>, vector<16x32xf32>
    %cst_58 = arith.constant dense<0xFF800000> : vector<32xf32>
    %232 = vector.multi_reduction <maximumf>, %231, %cst_58 [0] : vector<16x32xf32> to vector<32xf32>
    %233 = vector.shape_cast %232 : vector<32xf32> to vector<1x32xf32>
    %cst_59 = arith.constant dense<0.000000e+00> : vector<16x128xf32>
    %234 = tpu.matmul %230, %180, %cst_59 {dimension_numbers = #tpu.dot_dimension_numbers<[1], [0], [0], [1], [0, 0, 1, 1], [], []>} : vector<16x32xf32>, vector<32x128xf32>, vector<16x128xf32> -> vector<16x128xf32>
    %235 = arith.addf %163, %234 : vector<16x128xf32>
    %236 = math.tanh %235 : vector<16x128xf32>
    %237 = arith.mulf %175, %236 : vector<16x128xf32>
    %238 = arith.addf %172, %237 : vector<16x128xf32>
    %239 = vector.extract_strided_slice %238 {offsets = [0, 0], sizes = [16, 32], strides = [1, 1]} : vector<16x128xf32> to vector<16x32xf32>
    %240 = vector.extract_strided_slice %238 {offsets = [0, 32], sizes = [16, 32], strides = [1, 1]} : vector<16x128xf32> to vector<16x32xf32>
    %241 = vector.extract_strided_slice %238 {offsets = [0, 64], sizes = [16, 32], strides = [1, 1]} : vector<16x128xf32> to vector<16x32xf32>
    %242 = vector.extract_strided_slice %238 {offsets = [0, 96], sizes = [16, 32], strides = [1, 1]} : vector<16x128xf32> to vector<16x32xf32>
    %243 = arith.mulf %240, %228 : vector<16x32xf32>
    %244 = arith.mulf %239, %241 : vector<16x32xf32>
    %245 = arith.addf %243, %244 : vector<16x32xf32>
    %246 = math.tanh %245 : vector<16x32xf32>
    %247 = arith.mulf %242, %246 : vector<16x32xf32>
    %248 = arith.select %178, %247, %179 : vector<16x32xi1>, vector<16x32xf32>
    %cst_60 = arith.constant dense<0xFF800000> : vector<32xf32>
    %249 = vector.multi_reduction <maximumf>, %248, %cst_60 [0] : vector<16x32xf32> to vector<32xf32>
    %250 = vector.shape_cast %249 : vector<32xf32> to vector<1x32xf32>
    %251 = tpu.concatenate %199, %216, %233, %250 in 0 : vector<1x32xf32>, vector<1x32xf32>, vector<1x32xf32>, vector<1x32xf32> -> vector<4x32xf32>
    %c0_61 = arith.constant 0 : index
    %c0_62 = arith.constant 0 : index
    %252 = vector.load %arg9[%c0_61, %c0_62] : memref<32x1xf32, #tpu.memory_space<vmem>>, vector<32x1xf32>
    %cst_63 = arith.constant dense<0.000000e+00> : vector<4x1xf32>
    %253 = tpu.matmul %251, %252, %cst_63 {dimension_numbers = #tpu.dot_dimension_numbers<[1], [0], [0], [1], [0, 0, 1, 1], [], []>} : vector<4x32xf32>, vector<32x1xf32>, vector<4x1xf32> -> vector<4x1xf32>
    %c0_64 = arith.constant 0 : index
    %c0_65 = arith.constant 0 : index
    %254 = vector.load %arg10[%c0_64, %c0_65] : memref<1x1xf32, #tpu.memory_space<vmem>>, vector<1x1xf32>
    %255 = vector.broadcast %254 : vector<1x1xf32> to vector<4x1xf32>
    %256 = arith.addf %253, %255 : vector<4x1xf32>
    %257 = arith.negf %256 : vector<4x1xf32>
    %258 = math.exp %257 : vector<4x1xf32>
    %cst_66 = arith.constant 1.000000e+00 : f32
    %259 = vector.broadcast %cst_66 : f32 to vector<4x1xf32>
    %260 = arith.addf %259, %258 : vector<4x1xf32>
    %261 = arith.divf %259, %260 : vector<4x1xf32>
    %c0_67 = arith.constant 0 : index
    %c0_68 = arith.constant 0 : index
    %262 = vector.load %arg11[%c0_67, %c0_68] : memref<4x1xf32, #tpu.memory_space<vmem>>, vector<4x1xf32>
    tpu.vector_store %arg11[%c0_67, %c0_68], %261 {strides = array<i32>} : memref<4x1xf32, #tpu.memory_space<vmem>>, vector<4x1xf32>,
    return
  }
}

</mosaic_0001>

<bundles_post_ra>
// kernel: baseline_forward.1
= control target key start
LH: loop header
LB: loop body
LE: loop exit
PB: predicated region body
PF: predicated region fallthrough
CT: control target
= control target key end

     0   :  { %v2451_v0 = vmov 0   ;;  %s2456_s23 = smov 32   ;;  %s3317_s0 = inlined_call_operand.vmem [shape: s32[3,64,1], index: 0, kind: input, shape index: {}]   ;;  %s3318_s1 = inlined_call_operand.vmem [shape: f32[384,32], index: 1, kind: input, shape index: {}]   ;;  %s3319_s3 = inlined_call_operand.vmem [shape: f32[32,128], index: 3, kind: input, shape index: {}]   ;;  %s3320_s4 = inlined_call_operand.vmem [shape: f32[32,128], index: 4, kind: input, shape index: {}]   ;;  %s3321_s2 = inlined_call_operand.vmem [shape: f32[1,32], index: 2, kind: input, shape index: {}]   ;;  %s3322_s5 = inlined_call_operand.vmem [shape: f32[1,128], index: 5, kind: input, shape index: {}]   ;;  %s3323_s6 = inlined_call_operand.vmem [shape: f32[32,128], index: 6, kind: input, shape index: {}]   ;;  %s3324_s7 = inlined_call_operand.vmem [shape: f32[32,128], index: 7, kind: input, shape index: {}]   ;;  %s3325_s8 = inlined_call_operand.vmem [shape: f32[1,128], index: 8, kind: input, shape index: {}]   ;;  %s3326_s9 = inlined_call_operand.vmem [shape: f32[32,1], index: 9, kind: input, shape index: {}]   ;;  %s3327_s10 = inlined_call_operand.<no memory space> [shape: f32[1,1], index: 10, kind: input, shape index: {}]   ;;  %s3328_s11 = inlined_call_operand.vmem [shape: f32[4,1], index: 11, kind: output, shape index: {}]  }
   0x1   :  { %2382 = vset.pattern.permute.xlu1 %v2451_v0  ;;  %2381 = vset.pattern.permute.xlu0 %v2451_v0  ;;  %v1961_v1 = vld [vmem:[%s3317_s0 + $0x48] sm:$0xff]  ;;  %v1960_v2 = vld [vmem:[%s3317_s0 + $0x40] sm:$0xff]  ;;  %v44_v5 = vld [vmem:[%s3317_s0 + $0x10] sm:$0xff] }
   0x2   :  { %103 = vperm.xlu1 %2382, %v1961_v1   ;;  %100 = vperm.xlu0 %2381, %v1960_v2   ;;  %v43_v3 = vld [vmem:[%s3317_s0 + $0x8] sm:$0xff]  ;;  %v42_v4 = vld [vmem:[%s3317_s0] sm:$0xff]  ;;  %v1962_v6 = vld [vmem:[%s3317_s0 + $0x50] sm:$0xff] }
   0x3   :  { %v219_v7 = vld [vmem:[%s3318_s1 + $0xf8] sm:$0xff]  ;;  %v218_v9 = vld [vmem:[%s3318_s1 + $0xf0] sm:$0xff]  ;;  %v217_v13 = vld [vmem:[%s3318_s1 + $0xe8] sm:$0xff] }
   0x4   :  { %v203_v8 = vld [vmem:[%s3318_s1 + $0x78] sm:$0xff]  ;;  %2034 = vmatprep.subr.mxu0 %v219_v7  ;;  %v202_v12 = vld [vmem:[%s3318_s1 + $0x70] sm:$0xff]  ;;  %v201_v14 = vld [vmem:[%s3318_s1 + $0x68] sm:$0xff] }
   0x5   :  { %v45_v10 = vld [vmem:[%s3317_s0 + $0x18] sm:$0xff]  ;;  %2035 = vmatpush3.msra.mxu0 %v203_v8  ;;  %v46_v15 = vld [vmem:[%s3317_s0 + $0x20] sm:$0xff]  ;;  %v234_v20 = vld [vmem:[%s3318_s1 + $0x170] sm:$0xff] }
   0x6   :  { %54 = vperm.xlu1 %2382, %v43_v3   ;;  %51 = vperm.xlu0 %2381, %v42_v4   ;;  %v1963_v11 = vld [vmem:[%s3317_s0 + $0x58] sm:$0xff]  ;;  %v1964_v16 = vld [vmem:[%s3317_s0 + $0x60] sm:$0xff]  ;;  %v1965_v22 = vld [vmem:[%s3317_s0 + $0x68] sm:$0xff] }
   0x7   :  { %2036 = vmatprep.subr.mxu0 %v218_v9  ;;  %v216_v17 = vld [vmem:[%s3318_s1 + $0xe0] sm:$0xff]  ;;  %v235_v18 = vld [vmem:[%s3318_s1 + $0x178] sm:$0xff]  ;;  %v233_v25 = vld [vmem:[%s3318_s1 + $0x168] sm:$0xff]  ;;  %v40_v9 = vlaneseq }
   0x8   :  { %2037 = vmatpush3.msra.mxu0 %v202_v12  ;;  %v200_v19 = vld [vmem:[%s3318_s1 + $0x60] sm:$0xff]  ;;  %2191 = vmatprep.subr.mxu1 %v235_v18  ;;  %v215_v21 = vld [vmem:[%s3318_s1 + $0xd8] sm:$0xff]  ;;  %v214_v26 = vld [vmem:[%s3318_s1 + $0xd0] sm:$0xff] }
   0x9   :  { %2038 = vmatprep.subr.mxu0 %v217_v13  ;;  %v1968_v23 = vld [vmem:[%s3317_s0 + $0x80] sm:$0xff]  ;;  %2192 = vmatpush3.msra.mxu1 %v235_v18  ;;  %v199_v24 = vld [vmem:[%s3318_s1 + $0x58] sm:$0xff]  ;;  %v198_v27 = vld [vmem:[%s3318_s1 + $0x50] sm:$0xff]  ;;  %v2452_v13 = vmov 1.0  }
   0xa   :  { %57 = vperm.xlu1 %2382, %v44_v5   ;;  %106 = vperm.xlu0 %2381, %v1962_v6   ;;  %v232_v28 = vld [vmem:[%s3318_s1 + $0x160] sm:$0xff]  ;;  %v47_v29 = vld [vmem:[%s3317_s0 + $0x28] sm:$0xff]  ;;  %v231_v33 = vld [vmem:[%s3318_s1 + $0x158] sm:$0xff] }
   0xb   :  { %2039 = vmatpush3.msra.mxu0 %v201_v14  ;;  %2193 = vmatprep.subr.mxu1 %v234_v20  ;;  %v1969_v30 = vld [vmem:[%s3317_s0 + $0x88] sm:$0xff]  ;;  %v212_v34 = vld [vmem:[%s3318_s1 + $0xc0] sm:$0xff]  ;;  %v1966_v35 = vld [vmem:[%s3317_s0 + $0x70] sm:$0xff] }
   0xc   :  { %2040 = vmatprep.subr.mxu0 %v216_v17  ;;  %2194 = vmatpush3.msra.mxu1 %v234_v20  ;;  %v213_v31 = vld [vmem:[%s3318_s1 + $0xc8] sm:$0xff]  ;;  %v1970_v36 = vld [vmem:[%s3317_s0 + $0x90] sm:$0xff]  ;;  %v196_v37 = vld [vmem:[%s3318_s1 + $0x40] sm:$0xff] }
   0xd   :  { %2041 = vmatpush3.msra.mxu0 %v200_v19  ;;  %2195 = vmatprep.subr.mxu1 %v233_v25  ;;  %v197_v32 = vld [vmem:[%s3318_s1 + $0x48] sm:$0xff]  ;;  %v230_v38 = vld [vmem:[%s3318_s1 + $0x150] sm:$0xff]  ;;  %v211_v39 = vld [vmem:[%s3318_s1 + $0xb8] sm:$0xff] }
   0xe   :  { %60 = vperm.xlu1 %2382, %v45_v10   ;;  %109 = vperm.xlu0 %2381, %v1963_v11   ;;  %v195_v40 = vld [vmem:[%s3318_s1 + $0x38] sm:$0xff]  ;;  %v229_v41 = vld [vmem:[%s3318_s1 + $0x148] sm:$0xff]  ;;  %v48_v42 = vld [vmem:[%s3317_s0 + $0x30] sm:$0xff]  ;;  %v2735_v10 = vand.u32 127, %v40_v9 }
   0xf   :  { %2042 = vmatprep.subr.mxu0 %v215_v21  ;;  %2196 = vmatpush3.msra.mxu1 %v233_v25  ;;  %v1971_v43 = vld [vmem:[%s3317_s0 + $0x98] sm:$0xff]  ;;  %v210_v44 = vld [vmem:[%s3318_s1 + $0xb0] sm:$0xff]  ;;  %v228_v46 = vld [vmem:[%s3318_s1 + $0x140] sm:$0xff] }
  0x10   :  { %2043 = vmatpush3.msra.mxu0 %v199_v24  ;;  %2197 = vmatprep.subr.mxu1 %v232_v28  ;;  %v194_v45 = vld [vmem:[%s3318_s1 + $0x30] sm:$0xff]  ;;  %v209_v47 = vld [vmem:[%s3318_s1 + $0xa8] sm:$0xff]  ;;  %v1967_v48 = vld [vmem:[%s3317_s0 + $0x78] sm:$0xff] }
  0x11   :  { %2044 = vmatprep.subr.mxu0 %v214_v26  ;;  %2198 = vmatpush3.msra.mxu1 %v232_v28  ;;  %v1972_v49 = vld [vmem:[%s3317_s0 + $0xa0] sm:$0xff]  ;;  %v193_v50 = vld [vmem:[%s3318_s1 + $0x28] sm:$0xff]  ;;  %v227_v51 = vld [vmem:[%s3318_s1 + $0x138] sm:$0xff] }
  0x12   :  { %63 = vperm.xlu1 %2382, %v46_v15   ;;  %112 = vperm.xlu0 %2381, %v1964_v16   ;;  %v208_v52 = vld [vmem:[%s3318_s1 + $0xa0] sm:$0xff]  ;;  %v226_v54 = vld [vmem:[%s3318_s1 + $0x130] sm:$0xff]  ;;  %v49_v55 = vld [vmem:[%s3317_s0 + $0x38] sm:$0xff] }
  0x13   :  { %2045 = vmatpush3.msra.mxu0 %v198_v27  ;;  %2199 = vmatprep.subr.mxu1 %v231_v33  ;;  %v192_v53 = vld [vmem:[%s3318_s1 + $0x20] sm:$0xff]  ;;  %v1973_v56 = vld [vmem:[%s3317_s0 + $0xa8] sm:$0xff]  ;;  %v207_v57 = vld [vmem:[%s3318_s1 + $0x98] sm:$0xff] }
  0x14   :  { %2046 = vmatprep.subr.mxu0 %v213_v31  ;;  %2200 = vmatpush3.msra.mxu1 %v231_v33  ;;  %v191_v58 = vld [vmem:[%s3318_s1 + $0x18] sm:$0xff]  ;;  %v225_v59 = vld [vmem:[%s3318_s1 + $0x128] sm:$0xff]  ;;  %v206_v60 = vld [vmem:[%s3318_s1 + $0x90] sm:$0xff] }
  0x15   :  { %2047 = vmatpush3.msra.mxu0 %v197_v32  ;;  %2201 = vmatprep.subr.mxu1 %v230_v38  ;;  %v1975_v61 = vld [vmem:[%s3317_s0 + $0xb8] sm:$0xff]  ;;  %v1974_v62 = vld [vmem:[%s3317_s0 + $0xb0] sm:$0xff]  ;;  %v224_v0 = vld [vmem:[%s3318_s1 + $0x120] sm:$0xff] }
  0x16   :  { %115 = vperm.xlu1 %2382, %v1965_v22   ;;  %149 = vperm.xlu0 %2381, %v1968_v23   ;;  %v190_v63 = vld [vmem:[%s3318_s1 + $0x10] sm:$0xff]  ;;  %v205_v1 = vld [vmem:[%s3318_s1 + $0x88] sm:$0xff]  ;;  %v223_v3 = vld [vmem:[%s3318_s1 + $0x118] sm:$0xff] }
  0x17   :  { %2048 = vmatprep.subr.mxu0 %v212_v34  ;;  %2202 = vmatpush3.msra.mxu1 %v230_v38  ;;  %v189_v2 = vld [vmem:[%s3318_s1 + $0x8] sm:$0xff]  ;;  %v204_v4 = vld [vmem:[%s3318_s1 + $0x80] sm:$0xff]  ;;  %v222_v6 = vld [vmem:[%s3318_s1 + $0x110] sm:$0xff] }
  0x18   :  { %2049 = vmatpush3.msra.mxu0 %v196_v37  ;;  %2203 = vmatprep.subr.mxu1 %v229_v41  ;;  %v188_v5 = vld [vmem:[%s3318_s1] sm:$0xff]  ;;  %v221_v7 = vld [vmem:[%s3318_s1 + $0x108] sm:$0xff]  ;;  %v2791_v37 = vld [vmem:[%s3320_s4 + $0x18] sm:$0xff] }
  0x19   :  { %2050 = vmatprep.subr.mxu0 %v211_v39  ;;  %2204 = vmatpush3.msra.mxu1 %v229_v41  ;;  %v220_v8 = vld [vmem:[%s3318_s1 + $0x100] sm:$0xff]  ;;  %v463_v38 = vld [vmem:[%s3319_s3 + $0x10] sm:$0xff]  ;;  %v462_v39 = vld [vmem:[%s3319_s3 + $0x8] sm:$0xff] }
  0x1a   :  { %66 = vperm.xlu1 %2382, %v47_v29   ;;  %152 = vperm.xlu0 %2381, %v1969_v30   ;;  %v2807_v41 = vld [vmem:[%s3320_s4 + $0x10] sm:$0xff] }
  0x1b   :  { %2051 = vmatpush3.msra.mxu0 %v195_v40  ;;  %2205 = vmatprep.subr.mxu1 %v228_v46  ;;  %v461_v40 = vld [vmem:[%s3319_s3] sm:$0xff] }
  0x1c   :  { %2052 = vmatprep.subr.mxu0 %v210_v44  ;;  %2206 = vmatpush3.msra.mxu1 %v228_v46  ;;  %v2453_v44 = vmov 0.0  }
  0x1d   :  { %2053 = vmatpush3.msra.mxu0 %v194_v45  ;;  %2207 = vmatprep.subr.mxu1 %v227_v51 }
  0x1e   :  { %118 = vperm.xlu1 %2382, %v1966_v35   ;;  %155 = vperm.xlu0 %2381, %v1970_v36   ;;  %v464_v36 = vld [vmem:[%s3319_s3 + $0x18] sm:$0xff] }
  0x1f   :  { %2054 = vmatprep.subr.mxu0 %v209_v47  ;;  %2208 = vmatpush3.msra.mxu1 %v227_v51 }
  0x20   :  { %2055 = vmatpush3.msra.mxu0 %v193_v50  ;;  %2209 = vmatprep.subr.mxu1 %v226_v54 }
  0x21   :  { %2056 = vmatprep.subr.mxu0 %v208_v52  ;;  %2210 = vmatpush3.msra.mxu1 %v226_v54 }
  0x22   :  { %69 = vperm.xlu1 %2382, %v48_v42   ;;  %158 = vperm.xlu0 %2381, %v1971_v43   ;;  %v2815_v42 = vld [vmem:[%s3320_s4 + $0x8] sm:$0xff]  ;;  %v2822_v43 = vld [vmem:[%s3320_s4] sm:$0xff] }
  0x23   :  { %2057 = vmatpush3.msra.mxu0 %v192_v53  ;;  %2211 = vmatprep.subr.mxu1 %v225_v59 }
  0x24   :  { %2058 = vmatprep.subr.mxu0 %v207_v57  ;;  %2212 = vmatpush3.msra.mxu1 %v225_v59 }
  0x25   :  { %2059 = vmatpush3.msra.mxu0 %v191_v58  ;;  %2213 = vmatprep.subr.mxu1 %v224_v0 }
  0x26   :  { %121 = vperm.xlu1 %2382, %v1967_v48   ;;  %161 = vperm.xlu0 %2381, %v1972_v49  }
  0x27   :  { %2060 = vmatprep.subr.mxu0 %v206_v60  ;;  %2214 = vmatpush3.msra.mxu1 %v224_v0 }
  0x28   :  { %2061 = vmatpush3.msra.mxu0 %v190_v63  ;;  %2215 = vmatprep.subr.mxu1 %v223_v3 }
  0x29   :  { %2062 = vmatprep.subr.mxu0 %v205_v1  ;;  %2216 = vmatpush3.msra.mxu1 %v223_v3 }
  0x2a   :  { %72 = vperm.xlu1 %2382, %v49_v55   ;;  %164 = vperm.xlu0 %2381, %v1973_v56   ;;  %v1976_v56 = vld [vmem:[%s3321_s2] ss:$0 sm:$0xff] }
  0x2b   :  { %2063 = vmatpush3.msra.mxu0 %v189_v2  ;;  %2217 = vmatprep.subr.mxu1 %v222_v6 }
  0x2c   :  { %2064 = vmatprep.subr.mxu0 %v204_v4  ;;  %2218 = vmatpush3.msra.mxu1 %v222_v6 }
  0x2d   :  { %2065 = vmatpush3.msra.mxu0 %v188_v5  ;;  %2219 = vmatprep.subr.mxu1 %v221_v7 }
  0x2e   :  { %170 = vperm.xlu1 %2382, %v1975_v61   ;;  %167 = vperm.xlu0 %2381, %v1974_v62  }
  0x2f   :  { %2220 = vmatpush3.msra.mxu1 %v221_v7  ;;  %2255 = vmatprep.subr.mxu0 %v2791_v37 }
  0x30   :  { %2221 = vmatprep.subr.mxu1 %v220_v8 }
  0x31   :  { %2222 = vmatpush3.msra.mxu1 %v220_v8 }
  0x32   :  { %2235 = vmatprep.subr.mxu1 %v464_v36 }
  0x7d   :  { %v104_v11 = vpop.permute.xlu1 %103  ;;  %v101_v12 = vpop.permute.xlu0 %100 }
  0x7e   :  { %vm123_vm0 = vcmp.eq.s32.totalorder %v2735_v10, %v101_v12  ;;  %vm124_vm2 = vcmp.eq.s32.totalorder %v2735_v10, %v104_v11 }
  0x7f   :  { %1977 = vmatprep.mubr.msk.f32.mxu0 %vm123_vm0, %v2452_v13 }
  0x81   :  { %v55_v14 = vpop.permute.xlu1 %54  ;;  %v52_v15 = vpop.permute.xlu0 %51 }
  0x82   :  { %vm74_vm1 = vcmp.eq.s32.totalorder %v2735_v10, %v52_v15  ;;  %vm75_vm3 = vcmp.eq.s32.totalorder %v2735_v10, %v55_v14 }
  0x83   :  { %1978 = vmatmul.mubr.msk.f32.vlgmr.msra.gmra.mxu0 %vm74_vm1, %v2452_v13 }
  0x84   :  { %1979 = vmatprep.mubr.msk.f32.mxu0 %vm124_vm2, %v2452_v13  ;;  %2256 = vmatpush3.msra.mxu0 %v2791_v37 }
  0x85   :  { %v58_v16 = vpop.permute.xlu1 %57  ;;  %v107_v17 = vpop.permute.xlu0 %106  ;;  %2257 = vmatprep.subr.mxu0 %v2807_v41 }
  0x86   :  { %vm125_vm4 = vcmp.eq.s32.totalorder %v2735_v10, %v107_v17  ;;  %vm76_vm5 = vcmp.eq.s32.totalorder %v2735_v10, %v58_v16  ;;  %2258 = vmatpush3.msra.mxu0 %v2807_v41 }
  0x87   :  { %1980 = vmatmul.mubr.msk.f32.gmra.mxu0 %vm75_vm3, %v2452_v13  ;;  %2259 = vmatprep.subr.mxu0 %v2815_v42 }
  0x88   :  { %1981 = vmatprep.mubr.msk.f32.mxu0 %vm125_vm4, %v2452_v13  ;;  %2260 = vmatpush3.msra.mxu0 %v2815_v42 }
  0x89   :  { %v61_v18 = vpop.permute.xlu1 %60  ;;  %v110_v19 = vpop.permute.xlu0 %109  ;;  %2261 = vmatprep.subr.mxu0 %v2822_v43 }
  0x8a   :  { %vm126_vm6 = vcmp.eq.s32.totalorder %v2735_v10, %v110_v19  ;;  %vm77_vm7 = vcmp.eq.s32.totalorder %v2735_v10, %v61_v18  ;;  %2262 = vmatpush3.msra.mxu0 %v2822_v43 }
  0x8b   :  { %1982 = vmatmul.mubr.msk.f32.gmra.mxu0 %vm76_vm5, %v2452_v13  ;;  %2277 = vmatprep.subr.mxu0 %v2791_v37 }
  0x8c   :  { %1983 = vmatprep.mubr.msk.f32.mxu0 %vm126_vm6, %v2452_v13 }
  0x8d   :  { %v64_v20 = vpop.permute.xlu1 %63  ;;  %v113_v21 = vpop.permute.xlu0 %112 }
  0x8e   :  { %vm127_vm8 = vcmp.eq.s32.totalorder %v2735_v10, %v113_v21  ;;  %vm78_vm9 = vcmp.eq.s32.totalorder %v2735_v10, %v64_v20 }
  0x8f   :  { %1984 = vmatmul.mubr.msk.f32.gmra.mxu0 %vm77_vm7, %v2452_v13 }
  0x90   :  { %1985 = vmatprep.mubr.msk.f32.mxu0 %vm127_vm8, %v2452_v13  ;;  %vm472_vm8 = vcmask 261120  }
  0x91   :  { %v116_v22 = vpop.permute.xlu1 %115  ;;  %v150_v23 = vpop.permute.xlu0 %149 }
  0x92   :  { %vm128_vm10 = vcmp.eq.s32.totalorder %v2735_v10, %v116_v22  ;;  %vm172_vm11 = vcmp.eq.s32.totalorder %v2735_v10, %v150_v23 }
  0x93   :  { %1986 = vmatmul.mubr.msk.f32.gmra.mxu0 %vm78_vm9, %v2452_v13  ;;  %2223 = vmatprep.mubr.msk.f32.mxu1 %vm172_vm11, %v2452_v13  ;;  %vm605_vm9 = vcmp.ge.s32.totalorder %v2735_v10, 32  ;;  %vm603_vm11 = vcmp.lt.s32.totalorder %v2735_v10, 16 }
  0x94   :  { %1987 = vmatprep.mubr.msk.f32.mxu0 %vm128_vm10, %v2452_v13  ;;  %vm606_vm10 = vcmp.lt.s32.totalorder %v2735_v10, 48 }
  0x95   :  { %v67_v24 = vpop.permute.xlu1 %66  ;;  %v153_v25 = vpop.permute.xlu0 %152 }
  0x96   :  { %vm79_vm12 = vcmp.eq.s32.totalorder %v2735_v10, %v67_v24  ;;  %vm173_vm13 = vcmp.eq.s32.totalorder %v2735_v10, %v153_v25 }
  0x97   :  { %1988 = vmatmul.mubr.msk.f32.gmra.mxu0 %vm79_vm12, %v2452_v13  ;;  %2224 = vmatmul.mubr.msk.f32.vlgmr.msra.gmra.mxu1 %vm173_vm13, %v2452_v13  ;;  %vm607_vm12 = vmand %vm605_vm9, %vm606_vm10  ;;  %vm609_vm13 = vcmp.ge.s32.totalorder %v2735_v10, 64  ;;  %vm1432_vm10 = vcmask 1048320  }
  0x98   :  { %2236 = vmatpush3.msra.mxu1 %v464_v36 }
  0x99   :  { %v119_v26 = vpop.permute.xlu1 %118  ;;  %v156_v27 = vpop.permute.xlu0 %155  ;;  %2237 = vmatprep.subr.mxu1 %v463_v38 }
  0x9a   :  { %vm129_vm14 = vcmp.eq.s32.totalorder %v2735_v10, %v119_v26  ;;  %vm174_vm15 = vcmp.eq.s32.totalorder %v2735_v10, %v156_v27  ;;  %2238 = vmatpush3.msra.mxu1 %v463_v38 }
  0x9b   :  { %1989 = vmatprep.mubr.msk.f32.mxu0 %vm129_vm14, %v2452_v13  ;;  %2226 = vmatprep.mubr.msk.f32.mxu1 %vm174_vm15, %v2452_v13  ;;  %vm610_vm14 = vcmp.lt.s32.totalorder %v2735_v10, 80  ;;  %vm608_vm15 = vmor %vm603_vm11, %vm607_vm12  ;;  %vm1858_vm12 = vcmask 1041408  }
  0x9c   :  { %2239 = vmatprep.subr.mxu1 %v462_v39 }
  0x9d   :  { %v70_v28 = vpop.permute.xlu1 %69  ;;  %v159_v29 = vpop.permute.xlu0 %158  ;;  %2240 = vmatpush3.msra.mxu1 %v462_v39 }
  0x9e   :  { %vm80_vm0 = vcmp.eq.s32.totalorder %v2735_v10, %v70_v28  ;;  %vm175_vm1 = vcmp.eq.s32.totalorder %v2735_v10, %v159_v29  ;;  %2241 = vmatprep.subr.mxu1 %v461_v40 }
  0x9f   :  { %1990 = vmatmul.mubr.msk.f32.gmra.mxu0 %vm80_vm0, %v2452_v13  ;;  %2227 = vmatmul.mubr.msk.f32.gmra.mxu1 %vm175_vm1, %v2452_v13  ;;  %vm611_vm0 = vmand %vm609_vm13, %vm610_vm14  ;;  %vm613_vm1 = vcmp.ge.s32.totalorder %v2735_v10, 96  ;;  %vm1860_vm14 = vcmask 1042432  }
  0xa0   :  { %2242 = vmatpush3.msra.mxu1 %v461_v40 }
  0xa1   :  { %v122_v30 = vpop.permute.xlu1 %121  ;;  %v162_v31 = vpop.permute.xlu0 %161  ;;  %2266 = vmatprep.subr.mxu1 %v2791_v37 }
  0xa2   :  { %vm130_vm2 = vcmp.eq.s32.totalorder %v2735_v10, %v122_v30  ;;  %vm176_vm3 = vcmp.eq.s32.totalorder %v2735_v10, %v162_v31 }
  0xa3   :  { %1991 = vmatprep.mubr.msk.f32.mxu0 %vm130_vm2, %v2452_v13  ;;  %2229 = vmatprep.mubr.msk.f32.mxu1 %vm176_vm3, %v2452_v13  ;;  %vm614_vm2 = vcmp.lt.s32.totalorder %v2735_v10, 112  ;;  %vm612_vm3 = vmor %vm608_vm15, %vm611_vm0  ;;  %vm1954_vm15 = vcmask 3072  }
  0xa5   :  { %v73_v32 = vpop.permute.xlu1 %72  ;;  %v165_v33 = vpop.permute.xlu0 %164 }
  0xa6   :  { %vm81_vm4 = vcmp.eq.s32.totalorder %v2735_v10, %v73_v32  ;;  %vm177_vm5 = vcmp.eq.s32.totalorder %v2735_v10, %v165_v33 }
  0xa7   :  { %1992 = vmatmul.mubr.msk.f32.gmra.mxu0 %vm81_vm4, %v2452_v13  ;;  %2230 = vmatmul.mubr.msk.f32.gmra.mxu1 %vm177_vm5, %v2452_v13  ;;  %vm615_vm4 = vmand %vm613_vm1, %vm614_vm2 }
  0xa8   :  { %2263 = vmatprep.mubr.f32.mxu0 %v2453_v44  ;;  %vm2913_vm5 = vmor %vm612_vm3, %vm615_vm4 }
  0xa9   :  { %v171_v34 = vpop.permute.xlu1 %170  ;;  %v168_v35 = vpop.permute.xlu0 %167 }
  0xaa   :  { %vm179_vm6 = vcmp.eq.s32.totalorder %v2735_v10, %v171_v34  ;;  %vm178_vm7 = vcmp.eq.s32.totalorder %v2735_v10, %v168_v35 }
  0xab   :  { %2232 = vmatprep.mubr.msk.f32.mxu1 %vm178_vm7, %v2452_v13  ;;  %2264 = vmatmul.mubr.f32.vlgmr.msra.gmra.mxu0 %v2453_v44 }
  0xac   :  { %2233 = vmatmul.mubr.msk.f32.gmra.mxu1 %vm179_vm6, %v2452_v13  ;;  %2278 = vmatpush3.msra.mxu0 %v2791_v37  ;;  %vm617_vm6 = vcmp.lt.s32.totalorder %v2735_v10, 96  ;;  %v3192_v10 = vld [vmem:[%s3325_s8] ss:$0 sm:$0xff] }
  0xad   :  { %2279 = vmatprep.subr.mxu0 %v2807_v41  ;;  %vm618_vm7 = vmand %vm609_vm13, %vm617_vm6  ;;  %vm2457_vm13 = vmmov 0  }
  0xae   :  { %2280 = vmatpush3.msra.mxu0 %v2807_v41 }
  0xaf   :  { %2281 = vmatprep.subr.mxu0 %v2815_v42 }
  0xb0   :  { %2282 = vmatpush3.msra.mxu0 %v2815_v42 }
  0xb1   :  { %2283 = vmatprep.subr.mxu0 %v2822_v43 }
  0xb2   :  { %2284 = vmatpush3.msra.mxu0 %v2822_v43 }
 0x143   :  { %v2066_v45 = vpop.f32.mrf.mxu0 }
 0x145   :  { %v2067_v46 = vpop.f32.mrf.mxu0 }
 0x146   :  { %v2068_v55 = vadd.f32 %v2067_v46, %v2066_v45 }
 0x147   :  { %v2069_v47 = vpop.f32.mrf.mxu0 }
 0x148   :  { %v310_v60 = vadd.f32 %v2068_v55, %v1976_v56 }
 0x149   :  { %v2070_v48 = vpop.f32.mrf.mxu0 }
 0x14a   :  { %v2071_v53 = vadd.f32 %v2070_v48, %v2069_v47  ;;  %v2001_v47 = vld [vmem:[%s3322_s5] ss:$0 sm:$0xff]  ;;  %s2455_s5 = smov 64  }
 0x14b   :  { %v2072_v49 = vpop.f32.mrf.mxu0 }
 0x14c   :  { %v315_v58 = vadd.f32 %v2071_v53, %v1976_v56 }
 0x14d   :  { %v2073_v50 = vpop.f32.mrf.mxu0 }
 0x14e   :  { %v2074_v2 = vadd.f32 %v2073_v50, %v2072_v49 }
 0x14f   :  { %v2075_v51 = vpop.f32.mrf.mxu0 }
 0x150   :  { %v320_v8 = vadd.f32 %v2074_v2, %v1976_v56 }
 0x151   :  { %v2076_v52 = vpop.f32.mrf.mxu0 }
 0x152   :  { %v2077_v0 = vadd.f32 %v2076_v52, %v2075_v51 }
 0x153   :  { %v2078_v54 = vpop.f32.mrf.mxu0 }
 0x154   :  { %v325_v6 = vadd.f32 %v2077_v0, %v1976_v56 }
 0x155   :  { %v2079_v57 = vpop.f32.mrf.mxu0 }
 0x156   :  { %v2080_v16 = vadd.f32 %v2079_v57, %v2078_v54 }
 0x157   :  { %v2225_v59 = vpop.f32.mrf.mxu1  ;;  %v2081_v1 = vpop.f32.mrf.mxu0 }
 0x158   :  { %v2839_v61 = vadd.f32 %v2225_v59, %v315_v58  ;;  %v330_v23 = vadd.f32 %v2080_v16, %v1976_v56 }
 0x159   :  { %v414_v62 = vpop.f32.mrf.mxu1  ;;  %v2082_v5 = vpop.f32.mrf.mxu0 }
 0x15a   :  { %v2841_v63 = vadd.f32 %v414_v62, %v310_v60  ;;  %v454_v4 = vmax.f32 %v2839_v61, 0.0  ;;  %v2083_v15 = vadd.f32 %v2082_v5, %v2081_v1 }
 0x15c   :  { %v453_v3 = vmax.f32 %v2841_v63, 0.0  ;;  %v335_v21 = vadd.f32 %v2083_v15, %v1976_v56 }
 0x15e   :  { %2243 = vmatprep.mubr.msk.f32.mxu1 %vm472_vm8, %v453_v3 }
 0x15f   :  { %v2228_v7 = vpop.f32.mrf.mxu1  ;;  %2244 = vmatmul.mubr.msk.f32.vlgmr.msra.gmra.mxu1 %vm472_vm8, %v454_v4  ;;  %v2084_v11 = vpop.f32.mrf.mxu0 }
 0x160   :  { %2267 = vmatpush3.msra.mxu1 %v2791_v37  ;;  %v2852_v12 = vadd.f32 %v2228_v7, %v325_v6 }
 0x161   :  { %v424_v13 = vpop.f32.mrf.mxu1  ;;  %2268 = vmatprep.subr.mxu1 %v2807_v41  ;;  %v2085_v19 = vpop.f32.mrf.mxu0 }
 0x162   :  { %v2855_v14 = vadd.f32 %v424_v13, %v320_v8  ;;  %2269 = vmatpush3.msra.mxu1 %v2807_v41  ;;  %v456_v18 = vmax.f32 %v2852_v12, 0.0  ;;  %v2086_v24 = vadd.f32 %v2085_v19, %v2084_v11 }
 0x163   :  { %2270 = vmatprep.subr.mxu1 %v2815_v42 }
 0x164   :  { %v455_v17 = vmax.f32 %v2855_v14, 0.0  ;;  %2271 = vmatpush3.msra.mxu1 %v2815_v42  ;;  %v340_v34 = vadd.f32 %v2086_v24, %v1976_v56 }
 0x165   :  { %2272 = vmatprep.subr.mxu1 %v2822_v43 }
 0x166   :  { %2246 = vmatprep.mubr.msk.f32.mxu1 %vm472_vm8, %v455_v17  ;;  %2273 = vmatpush3.msra.mxu1 %v2822_v43 }
 0x167   :  { %v2087_v20 = vpop.f32.mrf.mxu0  ;;  %v2231_v22 = vpop.f32.mrf.mxu1  ;;  %2247 = vmatmul.mubr.msk.f32.gmra.mxu1 %vm472_vm8, %v456_v18  ;;  %2288 = vmatprep.subr.mxu1 %v2791_v37 }
 0x168   :  { %v2871_v25 = vadd.f32 %v2231_v22, %v335_v21  ;;  %v2454_v21 = vmov 0.5  }
 0x169   :  { %v2088_v26 = vpop.f32.mrf.mxu0  ;;  %v434_v27 = vpop.f32.mrf.mxu1  ;;  %v2964_v22 = vsel %vm618_vm7, 1.0, %v2454_v21  ;;  %v2966_v24 = vsel %vm618_vm7, 0.0, %v2454_v21 }
 0x16a   :  { %v2089_v28 = vadd.f32 %v2088_v26, %v2087_v20  ;;  %v2873_v29 = vadd.f32 %v434_v27, %v330_v23  ;;  %v458_v33 = vmax.f32 %v2871_v25, 0.0 }
 0x16b   :  { %v2265_v2 = vpop.f32.mrf.mxu0 }
 0x16c   :  { %v457_v30 = vmax.f32 %v2873_v29, 0.0  ;;  %v345_v31 = vadd.f32 %v2089_v28, %v1976_v56  ;;  %v2234_v32 = vpop.f32.mrf.mxu1 }
 0x16d   :  { %v702_v16 = vpop.f32.mrf.mxu0 }
 0x16e   :  { %v2877_v35 = vadd.f32 %v2234_v32, %v345_v31  ;;  %v444_v36 = vpop.f32.mrf.mxu1  ;;  %2249 = vmatprep.mubr.msk.f32.mxu1 %vm472_vm8, %v457_v30 }
 0x16f   :  { %v2882_v38 = vadd.f32 %v444_v36, %v340_v34  ;;  %2250 = vmatmul.mubr.msk.f32.gmra.mxu1 %vm472_vm8, %v458_v33 }
 0x170   :  { %v460_v40 = vmax.f32 %v2877_v35, 0.0 }
 0x171   :  { %v459_v39 = vmax.f32 %v2882_v38, 0.0 }
 0x173   :  { %2252 = vmatprep.mubr.msk.f32.mxu1 %vm472_vm8, %v459_v39 }
 0x174   :  { %2253 = vmatmul.mubr.msk.f32.gmra.mxu1 %vm472_vm8, %v460_v40 }
 0x21f   :  { %v2245_v45 = vpop.f32.mrf.mxu1 }
 0x220   :  { %v2937_v0 = vadd.f32 %v2245_v45, %v2001_v47 }
 0x221   :  { %v563_v46 = vpop.f32.mrf.mxu1 }
 0x222   :  { %v2941_v6 = vadd.f32 %v2001_v47, %v563_v46 }
 0x227   :  { %v2248_v48 = vpop.f32.mrf.mxu1 }
 0x228   :  { %v2905_v49 = vadd.f32 %v2248_v48, %v2001_v47 }
 0x229   :  { %v573_v50 = vpop.f32.mrf.mxu1 }
 0x22a   :  { %v2911_v51 = vadd.f32 %v2001_v47, %v573_v50 }
 0x22f   :  { %v2251_v52 = vpop.f32.mrf.mxu1 }
 0x230   :  { %v2917_v54 = vadd.f32 %v2251_v52, %v2001_v47 }
 0x231   :  { %v583_v55 = vpop.f32.mrf.mxu1 }
 0x232   :  { %v2919_v56 = vadd.f32 %v2001_v47, %v583_v55  ;;  %v624_v57 = vsel %vm2913_vm5, %v2905_v49, %v2917_v54  ;;  %v626_v58 = vsel %vm2913_vm5, %v2917_v54, %v2905_v49 }
 0x234   :  { %v2254_v59 = vpop.f32.mrf.mxu1  ;;  %v623_v60 = vsel %vm2913_vm5, %v2911_v51, %v2919_v56  ;;  %v625_v62 = vsel %vm2913_vm5, %v2919_v56, %v2911_v51 }
 0x235   :  { %v2939_v1 = vadd.f32 %v2254_v59, %v2001_v47 }
 0x236   :  { %v593_v5 = vpop.f32.mrf.mxu1 }
 0x237   :  { %v622_v7 = vsel %vm2913_vm5, %v2937_v0, %v2939_v1  ;;  %v2947_v8 = vadd.f32 %v2001_v47, %v593_v5  ;;  %v628_v11 = vsel %vm2913_vm5, %v2939_v1, %v2937_v0 }
 0x238   :  { %v712_v13 = vadd.f32 %v2265_v2, %v622_v7 }
 0x239   :  { %v621_v15 = vsel %vm2913_vm5, %v2941_v6, %v2947_v8  ;;  %v627_v19 = vsel %vm2913_vm5, %v2947_v8, %v2941_v6 }
 0x23a   :  { %2383 = vtanh.f32 %v712_v13  ;;  %v711_v20 = vadd.f32 %v702_v16, %v621_v15 }
 0x23c   :  { %2385 = vtanh.f32 %v711_v20 }
 0x247   :  { %v2384_v23 = vpop.eup %2383 }
 0x248   :  { %v716_v26 = vmul.f32 %v2384_v23, %v2964_v22 }
 0x249   :  { %v2386_v27 = vpop.eup %2385 }
 0x24a   :  { %v718_v28 = vadd.f32 %v716_v26, %v2966_v24  ;;  %v715_v31 = vmul.f32 %v2386_v27, %v2964_v22 }
 0x24c   :  { %725 = vrot.lane.b32.xlu1 %v718_v28, %s2455_s5  ;;  %v717_v32 = vadd.f32 %v715_v31, %v2966_v24  ;;  %v720_v47 = vmul.f32 0.0, %v718_v28 }
 0x24e   :  { %723 = vrot.lane.b32.xlu0 %v717_v32, %s2455_s5  ;;  %v719_v52 = vmul.f32 0.0, %v717_v32 }
 0x2be   :  { %v726_v34 = vpop.permute.xlu1 %725 }
 0x2bf   :  { %v730_v36 = vmul.f32 %v726_v34, %v718_v28 }
 0x2c0   :  { %v724_v45 = vpop.permute.xlu0 %723 }
 0x2c1   :  { %v729_v46 = vmul.f32 %v724_v45, %v717_v32  ;;  %735 = vrot.lane.b32.xlu1 %v730_v36, %s2456_s23 }
 0x2c3   :  { %733 = vrot.lane.b32.xlu0 %v729_v46, %s2456_s23 }
 0x333   :  { %v736_v48 = vpop.permute.xlu1 %735 }
 0x334   :  { %v740_v50 = vadd.f32 %v736_v48, %v720_v47 }
 0x335   :  { %v734_v55 = vpop.permute.xlu0 %733 }
 0x336   :  { %2387 = vtanh.f32 %v740_v50  ;;  %v739_v59 = vadd.f32 %v734_v55, %v719_v52 }
 0x338   :  { %2389 = vtanh.f32 %v739_v59 }
 0x343   :  { %v2388_v2 = vpop.eup %2387 }
 0x344   :  { %747 = vrot.lane.b32.xlu1 %v2388_v2, %s2455_s5 }
 0x345   :  { %v2390_v5 = vpop.eup %2389 }
 0x346   :  { %745 = vrot.lane.b32.xlu0 %v2390_v5, %s2455_s5 }
 0x3b6   :  { %v748_v7 = vpop.permute.xlu1 %747 }
 0x3b7   :  { %v752_v13 = vmul.f32 %v748_v7, %v718_v28 }
 0x3b8   :  { %v746_v15 = vpop.permute.xlu0 %745 }
 0x3b9   :  { %v751_v16 = vmul.f32 %v746_v15, %v717_v32  ;;  %757 = vrot.lane.b32.xlu1 %v752_v13, %s2456_s23 }
 0x3bb   :  { %755 = vrot.lane.b32.xlu0 %v751_v16, %s2456_s23 }
 0x42b   :  { %v2982_v21 = vpop.permute.xlu1 %757 }
 0x42d   :  { %v2980_v20 = vpop.permute.xlu0 %755 }
 0x42e   :  { %2274 = vmatprep.mubr.msk.f32.mxu1 %vm472_vm8, %v2980_v20 }
 0x42f   :  { %2275 = vmatmul.mubr.msk.f32.vlgmr.msra.gmra.mxu1 %vm472_vm8, %v2982_v21 }
 0x430   :  { %2289 = vmatpush3.msra.mxu1 %v2791_v37 }
 0x431   :  { %2290 = vmatprep.subr.mxu1 %v2807_v41 }
 0x432   :  { %2291 = vmatpush3.msra.mxu1 %v2807_v41 }
 0x433   :  { %2292 = vmatprep.subr.mxu1 %v2815_v42 }
 0x434   :  { %2293 = vmatpush3.msra.mxu1 %v2815_v42 }
 0x435   :  { %2294 = vmatprep.subr.mxu1 %v2822_v43 }
 0x436   :  { %2295 = vmatpush3.msra.mxu1 %v2822_v43 }
 0x4ef   :  { %v2276_v23 = vpop.f32.mrf.mxu1 }
 0x4f0   :  { %v839_v26 = vadd.f32 %v2276_v23, %v624_v57 }
 0x4f1   :  { %v829_v37 = vpop.f32.mrf.mxu1 }
 0x4f2   :  { %2391 = vtanh.f32 %v839_v26  ;;  %v838_v41 = vadd.f32 %v829_v37, %v623_v60 }
 0x4f4   :  { %2393 = vtanh.f32 %v838_v41 }
 0x4ff   :  { %v2392_v42 = vpop.eup %2391 }
 0x500   :  { %v843_v27 = vmul.f32 %v2392_v42, %v2964_v22 }
 0x501   :  { %v2394_v43 = vpop.eup %2393 }
 0x502   :  { %v845_v28 = vadd.f32 %v843_v27, %v2966_v24  ;;  %v842_v31 = vmul.f32 %v2394_v43, %v2964_v22 }
 0x504   :  { %852 = vrot.lane.b32.xlu1 %v845_v28, %s2455_s5  ;;  %v844_v57 = vadd.f32 %v842_v31, %v2966_v24  ;;  %v847_v60 = vmul.f32 %v845_v28, %v740_v50 }
 0x506   :  { %850 = vrot.lane.b32.xlu0 %v844_v57, %s2455_s5  ;;  %v846_v48 = vmul.f32 %v844_v57, %v739_v59 }
 0x576   :  { %v853_v32 = vpop.permute.xlu1 %852 }
 0x577   :  { %v857_v34 = vmul.f32 %v853_v32, %v845_v28 }
 0x578   :  { %v851_v36 = vpop.permute.xlu0 %850 }
 0x579   :  { %v856_v45 = vmul.f32 %v851_v36, %v844_v57  ;;  %862 = vrot.lane.b32.xlu1 %v857_v34, %s2456_s23 }
 0x57b   :  { %860 = vrot.lane.b32.xlu0 %v856_v45, %s2456_s23 }
 0x5eb   :  { %v863_v46 = vpop.permute.xlu1 %862 }
 0x5ec   :  { %v867_v47 = vadd.f32 %v863_v46, %v847_v60 }
 0x5ed   :  { %v861_v52 = vpop.permute.xlu0 %860 }
 0x5ee   :  { %2395 = vtanh.f32 %v867_v47  ;;  %v866_v55 = vadd.f32 %v861_v52, %v846_v48 }
 0x5f0   :  { %2397 = vtanh.f32 %v866_v55 }
 0x5fb   :  { %v2396_v2 = vpop.eup %2395 }
 0x5fc   :  { %874 = vrot.lane.b32.xlu1 %v2396_v2, %s2455_s5 }
 0x5fd   :  { %v2398_v5 = vpop.eup %2397 }
 0x5fe   :  { %872 = vrot.lane.b32.xlu0 %v2398_v5, %s2455_s5 }
 0x66e   :  { %v875_v7 = vpop.permute.xlu1 %874 }
 0x66f   :  { %v879_v13 = vmul.f32 %v875_v7, %v845_v28 }
 0x670   :  { %v873_v15 = vpop.permute.xlu0 %872 }
 0x671   :  { %v878_v16 = vmul.f32 %v873_v15, %v844_v57  ;;  %884 = vrot.lane.b32.xlu1 %v879_v13, %s2456_s23 }
 0x673   :  { %882 = vrot.lane.b32.xlu0 %v878_v16, %s2456_s23 }
 0x6e3   :  { %v3019_v59 = vpop.permute.xlu1 %884 }
 0x6e5   :  { %v3017_v50 = vpop.permute.xlu0 %882 }
 0x6e6   :  { %2285 = vmatprep.mubr.msk.f32.mxu0 %vm472_vm8, %v3017_v50 }
 0x6e7   :  { %2286 = vmatmul.mubr.msk.f32.vlgmr.msra.gmra.mxu0 %vm472_vm8, %v3019_v59 }
 0x7a7   :  { %v2287_v23 = vpop.f32.mrf.mxu0 }
 0x7a8   :  { %v966_v26 = vadd.f32 %v2287_v23, %v626_v58 }
 0x7a9   :  { %v956_v37 = vpop.f32.mrf.mxu0 }
 0x7aa   :  { %2399 = vtanh.f32 %v966_v26  ;;  %v965_v41 = vadd.f32 %v956_v37, %v625_v62 }
 0x7ac   :  { %2401 = vtanh.f32 %v965_v41 }
 0x7b7   :  { %v2400_v42 = vpop.eup %2399 }
 0x7b8   :  { %v970_v27 = vmul.f32 %v2400_v42, %v2964_v22 }
 0x7b9   :  { %v2402_v43 = vpop.eup %2401 }
 0x7ba   :  { %v972_v28 = vadd.f32 %v970_v27, %v2966_v24  ;;  %v969_v31 = vmul.f32 %v2402_v43, %v2964_v22 }
 0x7bc   :  { %979 = vrot.lane.b32.xlu1 %v972_v28, %s2455_s5  ;;  %v971_v49 = vadd.f32 %v969_v31, %v2966_v24  ;;  %v974_v56 = vmul.f32 %v972_v28, %v867_v47 }
 0x7be   :  { %977 = vrot.lane.b32.xlu0 %v971_v49, %s2455_s5  ;;  %v973_v34 = vmul.f32 %v971_v49, %v866_v55 }
 0x82e   :  { %v980_v54 = vpop.permute.xlu1 %979 }
 0x82f   :  { %v984_v58 = vmul.f32 %v980_v54, %v972_v28  ;;  %v3080_v54 = vld [vmem:[%s3324_s7 + $0x18] sm:$0xff] }
 0x830   :  { %v978_v57 = vpop.permute.xlu0 %977  ;;  %2319 = vmatprep.subr.mxu1 %v3080_v54 }
 0x831   :  { %v983_v51 = vmul.f32 %v978_v57, %v971_v49  ;;  %989 = vrot.lane.b32.xlu1 %v984_v58, %s2456_s23 }
 0x833   :  { %987 = vrot.lane.b32.xlu0 %v983_v51, %s2456_s23  ;;  %v1166_v51 = vld [vmem:[%s3323_s6 + $0x10] sm:$0xff] }
 0x8a3   :  { %v990_v62 = vpop.permute.xlu1 %989 }
 0x8a4   :  { %v994_v32 = vadd.f32 %v990_v62, %v974_v56  ;;  %v3092_v56 = vld [vmem:[%s3324_s7 + $0x10] sm:$0xff]  ;;  %v1165_v62 = vld [vmem:[%s3323_s6 + $0x8] sm:$0xff] }
 0x8a5   :  { %v988_v36 = vpop.permute.xlu0 %987 }
 0x8a6   :  { %2403 = vtanh.f32 %v994_v32  ;;  %v993_v45 = vadd.f32 %v988_v36, %v973_v34  ;;  %v1164_v34 = vld [vmem:[%s3323_s6] sm:$0xff] }
 0x8a7   :  { %v3112_v36 = vld [vmem:[%s3324_s7] sm:$0xff] }
 0x8a8   :  { %2405 = vtanh.f32 %v993_v45 }
 0x8b3   :  { %v2404_v60 = vpop.eup %2403 }
 0x8b4   :  { %1001 = vrot.lane.b32.xlu1 %v2404_v60, %s2455_s5 }
 0x8b5   :  { %v2406_v46 = vpop.eup %2405 }
 0x8b6   :  { %999 = vrot.lane.b32.xlu0 %v2406_v46, %s2455_s5 }
 0x926   :  { %v1002_v48 = vpop.permute.xlu1 %1001 }
 0x927   :  { %v1006_v52 = vmul.f32 %v1002_v48, %v972_v28 }
 0x928   :  { %v1000_v2 = vpop.permute.xlu0 %999 }
 0x929   :  { %v1005_v5 = vmul.f32 %v1000_v2, %v971_v49  ;;  %1011 = vrot.lane.b32.xlu1 %v1006_v52, %s2456_s23  ;;  %v1167_v49 = vld [vmem:[%s3323_s6 + $0x18] sm:$0xff] }
 0x92a   :  { %2299 = vmatprep.subr.mxu0 %v1167_v49 }
 0x92b   :  { %1009 = vrot.lane.b32.xlu0 %v1005_v5, %s2456_s23  ;;  %2300 = vmatpush3.msra.mxu0 %v1167_v49 }
 0x92c   :  { %2301 = vmatprep.subr.mxu0 %v1166_v51 }
 0x92d   :  { %2302 = vmatpush3.msra.mxu0 %v1166_v51 }
 0x92e   :  { %2303 = vmatprep.subr.mxu0 %v1165_v62 }
 0x92f   :  { %2304 = vmatpush3.msra.mxu0 %v1165_v62 }
 0x930   :  { %2305 = vmatprep.subr.mxu0 %v1164_v34 }
 0x931   :  { %2306 = vmatpush3.msra.mxu0 %v1164_v34  ;;  %v1305_v34 = vshrl.u32 %v40_v9, 7 }
 0x932   :  { %2341 = vmatprep.subr.mxu0 %v3080_v54 }
 0x99b   :  { %v3049_v55 = vpop.permute.xlu1 %1011 }
 0x99c   :  { %v1157_v63 = vsel %vm603_vm11, %v3049_v55, %v3019_v59 }
 0x99d   :  { %v3047_v47 = vpop.permute.xlu0 %1009  ;;  %v1159_v12 = vadd.f32 %v1157_v63, %v458_v33 }
 0x99e   :  { %2296 = vmatprep.mubr.msk.f32.mxu1 %vm472_vm8, %v3047_v47 }
 0x99f   :  { %2297 = vmatmul.mubr.msk.f32.vlgmr.msra.gmra.mxu1 %vm472_vm8, %v3049_v55 }
 0x9a0   :  { %2327 = vmatprep.mubr.f32.mxu1 %v2453_v44  ;;  %2320 = vmatpush3.msra.mxu1 %v3080_v54 }
 0x9a1   :  { %2321 = vmatprep.subr.mxu1 %v3092_v56 }
 0x9a2   :  { %2322 = vmatpush3.msra.mxu1 %v3092_v56 }
 0xa5f   :  { %v2298_v7 = vpop.f32.mrf.mxu1 }
 0xa60   :  { %v1093_v13 = vadd.f32 %v2298_v7, %v628_v11  ;;  %v1152_v7 = vsel %vm603_vm11, %v3017_v50, %v3047_v47 }
 0xa61   :  { %v1083_v15 = vpop.f32.mrf.mxu1 }
 0xa62   :  { %2407 = vtanh.f32 %v1093_v13  ;;  %v1092_v16 = vadd.f32 %v1083_v15, %v627_v19 }
 0xa64   :  { %2409 = vtanh.f32 %v1092_v16 }
 0xa6f   :  { %v2408_v23 = vpop.eup %2407 }
 0xa70   :  { %v1097_v26 = vmul.f32 %v2408_v23, %v2964_v22  ;;  %v1153_v23 = vsel %vm603_vm11, %v3019_v59, %v3049_v55 }
 0xa71   :  { %v2410_v37 = vpop.eup %2409  ;;  %v1155_v61 = vadd.f32 %v1153_v23, %v456_v18 }
 0xa72   :  { %v1099_v41 = vadd.f32 %v1097_v26, %v2966_v24  ;;  %v1096_v42 = vmul.f32 %v2410_v37, %v2964_v22  ;;  %v1154_v26 = vadd.f32 %v1152_v7, %v455_v17  ;;  %v1156_v37 = vsel %vm603_vm11, %v3047_v47, %v3017_v50 }
 0xa74   :  { %1106 = vrot.lane.b32.xlu1 %v1099_v41, %s2455_s5  ;;  %v1098_v0 = vadd.f32 %v1096_v42, %v2966_v24  ;;  %v1101_v8 = vmul.f32 %v1099_v41, %v994_v32  ;;  %v3102_v32 = vld [vmem:[%s3324_s7 + $0x8] sm:$0xff] }
 0xa75   :  { %2323 = vmatprep.subr.mxu1 %v3102_v32 }
 0xa76   :  { %1104 = vrot.lane.b32.xlu0 %v1098_v0, %s2455_s5  ;;  %v1100_v43 = vmul.f32 %v1098_v0, %v993_v45  ;;  %2324 = vmatpush3.msra.mxu1 %v3102_v32 }
 0xa77   :  { %2325 = vmatprep.subr.mxu1 %v3112_v36 }
 0xa78   :  { %2326 = vmatpush3.msra.mxu1 %v3112_v36 }
 0xa79   :  { %2328 = vmatmul.mubr.f32.vlgmr.msra.gmra.mxu1 %v2453_v44  ;;  %2330 = vmatprep.subr.mxu1 %v3080_v54 }
 0xa7a   :  { %2331 = vmatpush3.msra.mxu1 %v3080_v54 }
 0xa7b   :  { %2332 = vmatprep.subr.mxu1 %v3092_v56 }
 0xa7c   :  { %2333 = vmatpush3.msra.mxu1 %v3092_v56 }
 0xa7d   :  { %2334 = vmatprep.subr.mxu1 %v3102_v32 }
 0xa7e   :  { %2335 = vmatpush3.msra.mxu1 %v3102_v32 }
 0xa7f   :  { %2336 = vmatprep.subr.mxu1 %v3112_v36 }
 0xa80   :  { %2337 = vmatpush3.msra.mxu1 %v3112_v36 }
 0xa81   :  { %2352 = vmatprep.subr.mxu1 %v3080_v54 }
 0xae6   :  { %v1107_v53 = vpop.permute.xlu1 %1106 }
 0xae7   :  { %v1111_v1 = vmul.f32 %v1107_v53, %v1099_v41 }
 0xae8   :  { %v1105_v11 = vpop.permute.xlu0 %1104 }
 0xae9   :  { %v1110_v6 = vmul.f32 %v1105_v11, %v1098_v0  ;;  %1116 = vrot.lane.b32.xlu1 %v1111_v1, %s2456_s23 }
 0xaeb   :  { %1114 = vrot.lane.b32.xlu0 %v1110_v6, %s2456_s23 }
 0xb39   :  { %v2329_v29 = vpop.f32.mrf.mxu1 }
 0xb5b   :  { %v1117_v19 = vpop.permute.xlu1 %1116 }
 0xb5c   :  { %v1121_v27 = vadd.f32 %v1117_v19, %v1101_v8 }
 0xb5d   :  { %v1115_v28 = vpop.permute.xlu0 %1114 }
 0xb5e   :  { %2411 = vtanh.f32 %v1121_v27  ;;  %v1120_v31 = vadd.f32 %v1115_v28, %v1100_v43 }
 0xb60   :  { %2413 = vtanh.f32 %v1120_v31 }
 0xb6b   :  { %v2412_v58 = vpop.eup %2411 }
 0xb6c   :  { %1128 = vrot.lane.b32.xlu1 %v2412_v58, %s2455_s5 }
 0xb6d   :  { %v2414_v57 = vpop.eup %2413 }
 0xb6e   :  { %1126 = vrot.lane.b32.xlu0 %v2414_v57, %s2455_s5 }
 0xbde   :  { %v1129_v45 = vpop.permute.xlu1 %1128 }
 0xbdf   :  { %v1133_v60 = vmul.f32 %v1129_v45, %v1099_v41  ;;  %v3214_v45 = vadd.s32 8, %v1305_v34 }
 0xbe0   :  { %v1127_v46 = vpop.permute.xlu0 %1126 }
 0xbe1   :  { %v1132_v48 = vmul.f32 %v1127_v46, %v1098_v0  ;;  %1140 = vrot.lane.b32.xlu1 %v1133_v60, %s2456_s23  ;;  %vm1308_vm9 = vcmp.lt.s32.totalorder %v3214_v45, 14 }
 0xbe3   :  { %1138 = vrot.lane.b32.xlu0 %v1132_v48, %s2456_s23 }
 0xc53   :  { %v1141_v52 = vpop.permute.xlu1 %1140 }
 0xc54   :  { %v1145_v2 = vsel %vm603_vm11, %v2982_v21, %v1141_v52  ;;  %v1161_v14 = vsel %vm603_vm11, %v1141_v52, %v2982_v21 }
 0xc55   :  { %v1139_v5 = vpop.permute.xlu0 %1138  ;;  %v1147_v16 = vadd.f32 %v1145_v2, %v454_v4  ;;  %v1163_v18 = vadd.f32 %v1161_v14, %v460_v40 }
 0xc56   :  { %v1144_v13 = vsel %vm603_vm11, %v2980_v20, %v1139_v5  ;;  %v1160_v4 = vsel %vm603_vm11, %v1139_v5, %v2980_v20  ;;  %v1379_v20 = vpop.f32.mrf.mxu1  ;;  %vm1856_vm11 = vcmask 1040384  }
 0xc57   :  { %v1146_v15 = vadd.f32 %v1144_v13, %v453_v3  ;;  %v1158_v3 = vadd.f32 %v1156_v37, %v457_v30  ;;  %v1162_v17 = vadd.f32 %v1160_v4, %v459_v39 }
 0xc59   :  { %2307 = vmatprep.mubr.msk.f32.mxu0 %vm472_vm8, %v1146_v15 }
 0xc5a   :  { %2308 = vmatmul.mubr.msk.f32.vlgmr.msra.gmra.mxu0 %vm472_vm8, %v1147_v16 }
 0xc5b   :  { %2310 = vmatprep.mubr.msk.f32.mxu0 %vm472_vm8, %v1154_v26  ;;  %2342 = vmatpush3.msra.mxu0 %v3080_v54 }
 0xc5c   :  { %2343 = vmatprep.subr.mxu0 %v3092_v56 }
 0xc5d   :  { %2344 = vmatpush3.msra.mxu0 %v3092_v56 }
 0xc5e   :  { %2311 = vmatmul.mubr.msk.f32.gmra.mxu0 %vm472_vm8, %v1155_v61  ;;  %2345 = vmatprep.subr.mxu0 %v3102_v32 }
 0xc5f   :  { %2313 = vmatprep.mubr.msk.f32.mxu0 %vm472_vm8, %v1158_v3  ;;  %2346 = vmatpush3.msra.mxu0 %v3102_v32 }
 0xc60   :  { %2347 = vmatprep.subr.mxu0 %v3112_v36 }
 0xc61   :  { %2348 = vmatpush3.msra.mxu0 %v3112_v36 }
 0xc62   :  { %2314 = vmatmul.mubr.msk.f32.gmra.mxu0 %vm472_vm8, %v1159_v12  ;;  %2363 = vmatprep.subr.mxu0 %v2453_v44 }
 0xc63   :  { %2316 = vmatprep.mubr.msk.f32.mxu0 %vm472_vm8, %v1162_v17 }
 0xc66   :  { %2317 = vmatmul.mubr.msk.f32.gmra.mxu0 %vm472_vm8, %v1163_v18 }
 0xd1a   :  { %v2309_v25 = vpop.f32.mrf.mxu0 }
 0xd1b   :  { %v1271_v30 = vadd.f32 %v2309_v25, %v3192_v10 }
 0xd1c   :  { %v1265_v33 = vpop.f32.mrf.mxu0 }
 0xd1d   :  { %v1389_v38 = vadd.f32 %v2329_v29, %v1271_v30  ;;  %v1266_v39 = vadd.f32 %v3192_v10, %v1265_v33 }
 0xd1e   :  { %v2312_v21 = vpop.f32.mrf.mxu0 }
 0xd1f   :  { %2415 = vtanh.f32 %v1389_v38  ;;  %v1388_v35 = vadd.f32 %v1379_v20, %v1266_v39  ;;  %v1281_v16 = vadd.f32 %v2312_v21, %v3192_v10 }
 0xd20   :  { %v1275_v40 = vpop.f32.mrf.mxu0 }
 0xd21   :  { %2417 = vtanh.f32 %v1388_v35  ;;  %v1276_v26 = vadd.f32 %v3192_v10, %v1275_v40 }
 0xd22   :  { %v3196_v50 = vpop.f32.mrf.mxu0 }
 0xd24   :  { %v3198_v59 = vpop.f32.mrf.mxu0 }
 0xd26   :  { %v2318_v47 = vpop.f32.mrf.mxu0 }
 0xd27   :  { %v3201_v55 = vadd.f32 %v2318_v47, %v3192_v10 }
 0xd2c   :  { %v2416_v41 = vpop.eup %2415 }
 0xd2d   :  { %v1393_v42 = vmul.f32 %v2416_v41, %v2964_v22 }
 0xd2e   :  { %v2418_v0 = vpop.eup %2417 }
 0xd2f   :  { %v1395_v53 = vadd.f32 %v1393_v42, %v2966_v24  ;;  %v1392_v1 = vmul.f32 %v2418_v0, %v2964_v22 }
 0xd31   :  { %1402 = vrot.lane.b32.xlu1 %v1395_v53, %s2455_s5  ;;  %v1394_v11 = vadd.f32 %v1392_v1, %v2966_v24  ;;  %v1397_v43 = vmul.f32 0.0, %v1395_v53 }
 0xd33   :  { %1400 = vrot.lane.b32.xlu0 %v1394_v11, %s2455_s5  ;;  %v1396_v49 = vmul.f32 0.0, %v1394_v11 }
 0xda3   :  { %v1403_v6 = vpop.permute.xlu1 %1402 }
 0xda4   :  { %v1407_v8 = vmul.f32 %v1403_v6, %v1395_v53 }
 0xda5   :  { %v1401_v19 = vpop.permute.xlu0 %1400 }
 0xda6   :  { %v1406_v27 = vmul.f32 %v1401_v19, %v1394_v11  ;;  %1412 = vrot.lane.b32.xlu1 %v1407_v8, %s2456_s23 }
 0xda8   :  { %1410 = vrot.lane.b32.xlu0 %v1406_v27, %s2456_s23 }
 0xe18   :  { %v1413_v28 = vpop.permute.xlu1 %1412 }
 0xe19   :  { %v1417_v31 = vadd.f32 %v1413_v28, %v1397_v43 }
 0xe1a   :  { %v1411_v58 = vpop.permute.xlu0 %1410 }
 0xe1b   :  { %2419 = vtanh.f32 %v1417_v31  ;;  %v1416_v57 = vadd.f32 %v1411_v58, %v1396_v49 }
 0xe1d   :  { %2421 = vtanh.f32 %v1416_v57 }
 0xe28   :  { %v2420_v51 = vpop.eup %2419 }
 0xe29   :  { %1424 = vrot.lane.b32.xlu1 %v2420_v51, %s2455_s5 }
 0xe2a   :  { %v2422_v62 = vpop.eup %2421 }
 0xe2b   :  { %1422 = vrot.lane.b32.xlu0 %v2422_v62, %s2455_s5 }
 0xe9b   :  { %v1425_v60 = vpop.permute.xlu1 %1424 }
 0xe9c   :  { %v1429_v46 = vmul.f32 %v1425_v60, %v1395_v53 }
 0xe9d   :  { %v1423_v48 = vpop.permute.xlu0 %1422 }
 0xe9e   :  { %v1431_v52 = vsel %vm1308_vm9, %v1429_v46, -inf  ;;  %v1428_v2 = vmul.f32 %v1423_v48, %v1394_v11  ;;  %1446 = vrot.lane.b32.xlu1 %v1429_v46, %s2456_s23  ;;  %v1295_v46 = vpop.f32.mrf.mxu0  ;;  %v1291_v48 = vadd.f32 %v3196_v50, %v3192_v10 }
 0xe9f   :  { %v1434_v5 = vsel %vm1432_vm10, %v1431_v52, -inf }
 0xea0   :  { %v1433_v7 = vsel %vm1432_vm10, %v1428_v2, -inf  ;;  %1444 = vrot.lane.b32.xlu0 %v1428_v2, %s2456_s23  ;;  %v1286_v2 = vadd.f32 %v3192_v10, %v3198_v59 }
 0xea1   :  { %v1435_v9 = vmax.f32 %v1433_v7, %v1434_v5 }
 0xea3   :  { %v1436_v35 = vrot.slane %v1435_v9, 4 }
 0xea5   :  { %v1437_v41 = vmax.f32 %v1435_v9, %v1436_v35 }
 0xea7   :  { %v1438_v6 = vrot.slane %v1437_v41, 2 }
 0xea9   :  { %v1439_v27 = vmax.f32 %v1437_v41, %v1438_v6 }
 0xf10   :  { %v1447_v15 = vpop.permute.xlu1 %1446 }
 0xf12   :  { %v1445_v13 = vpop.permute.xlu0 %1444 }
 0xf13   :  { %2338 = vmatprep.mubr.msk.f32.mxu1 %vm472_vm8, %v1445_v13 }
 0xf14   :  { %2339 = vmatmul.mubr.msk.f32.vlgmr.msra.gmra.mxu1 %vm472_vm8, %v1447_v15 }
 0xf15   :  { %2353 = vmatpush3.msra.mxu1 %v3080_v54 }
 0xf16   :  { %2354 = vmatprep.subr.mxu1 %v3092_v56 }
 0xf17   :  { %2355 = vmatpush3.msra.mxu1 %v3092_v56 }
 0xf18   :  { %2356 = vmatprep.subr.mxu1 %v3102_v32 }
 0xf19   :  { %2357 = vmatpush3.msra.mxu1 %v3102_v32 }
 0xf1a   :  { %2358 = vmatprep.subr.mxu1 %v3112_v36 }
 0xf1b   :  { %2359 = vmatpush3.msra.mxu1 %v3112_v36 }
 0xfd4   :  { %v2340_v23 = vpop.f32.mrf.mxu1 }
 0xfd5   :  { %v1528_v37 = vadd.f32 %v2340_v23, %v1281_v16 }
 0xfd6   :  { %v1518_v61 = vpop.f32.mrf.mxu1 }
 0xfd7   :  { %2423 = vtanh.f32 %v1528_v37  ;;  %v1527_v54 = vadd.f32 %v1518_v61, %v1276_v26 }
 0xfd9   :  { %2425 = vtanh.f32 %v1527_v54 }
 0xfe4   :  { %v2424_v63 = vpop.eup %2423 }
 0xfe5   :  { %v1532_v56 = vmul.f32 %v2424_v63, %v2964_v22 }
 0xfe6   :  { %v2426_v3 = vpop.eup %2425 }
 0xfe7   :  { %v1534_v32 = vadd.f32 %v1532_v56, %v2966_v24  ;;  %v1531_v4 = vmul.f32 %v2426_v3, %v2964_v22 }
 0xfe9   :  { %1541 = vrot.lane.b32.xlu1 %v1534_v32, %s2455_s5  ;;  %v1533_v36 = vadd.f32 %v1531_v4, %v2966_v24  ;;  %v1536_v25 = vmul.f32 %v1534_v32, %v1417_v31  ;;  %v1440_v31 = vrot.slane %v1439_v27, 1 }
 0xfeb   :  { %1539 = vrot.lane.b32.xlu0 %v1533_v36, %s2455_s5  ;;  %v1535_v33 = vmul.f32 %v1533_v36, %v1416_v57  ;;  %v1441_v57 = vmax.f32 %v1439_v27, %v1440_v31 }
0x105b   :  { %v1542_v12 = vpop.permute.xlu1 %1541 }
0x105c   :  { %v1546_v14 = vmul.f32 %v1542_v12, %v1534_v32 }
0x105d   :  { %v1540_v17 = vpop.permute.xlu0 %1539 }
0x105e   :  { %v1545_v18 = vmul.f32 %v1540_v17, %v1533_v36  ;;  %1551 = vrot.lane.b32.xlu1 %v1546_v14, %s2456_s23 }
0x1060   :  { %1549 = vrot.lane.b32.xlu0 %v1545_v18, %s2456_s23 }
0x10d0   :  { %v1552_v29 = vpop.permute.xlu1 %1551 }
0x10d1   :  { %v1556_v30 = vadd.f32 %v1552_v29, %v1536_v25 }
0x10d2   :  { %v1550_v38 = vpop.permute.xlu0 %1549 }
0x10d3   :  { %2427 = vtanh.f32 %v1556_v30  ;;  %v1555_v39 = vadd.f32 %v1550_v38, %v1535_v33 }
0x10d5   :  { %2429 = vtanh.f32 %v1555_v39 }
0x10e0   :  { %v2428_v20 = vpop.eup %2427 }
0x10e1   :  { %1563 = vrot.lane.b32.xlu1 %v2428_v20, %s2455_s5 }
0x10e2   :  { %v2430_v21 = vpop.eup %2429 }
0x10e3   :  { %1561 = vrot.lane.b32.xlu0 %v2430_v21, %s2455_s5 }
0x1153   :  { %v1564_v40 = vpop.permute.xlu1 %1563 }
0x1154   :  { %v1568_v47 = vmul.f32 %v1564_v40, %v1534_v32 }
0x1155   :  { %v1562_v42 = vpop.permute.xlu0 %1561 }
0x1156   :  { %v1570_v0 = vsel %vm1308_vm9, %v1568_v47, -inf  ;;  %v1567_v53 = vmul.f32 %v1562_v42, %v1533_v36  ;;  %1584 = vrot.lane.b32.xlu1 %v1568_v47, %s2456_s23 }
0x1157   :  { %v1572_v1 = vsel %vm1432_vm10, %v1570_v0, -inf }
0x1158   :  { %v1571_v11 = vsel %vm1432_vm10, %v1567_v53, -inf  ;;  %1582 = vrot.lane.b32.xlu0 %v1567_v53, %s2456_s23 }
0x1159   :  { %v1573_v8 = vmax.f32 %v1571_v11, %v1572_v1  ;;  %v1296_v11 = vadd.f32 %v3192_v10, %v1295_v46 }
0x115b   :  { %v1574_v19 = vrot.slane %v1573_v8, 4 }
0x115d   :  { %v1575_v43 = vmax.f32 %v1573_v8, %v1574_v19 }
0x115f   :  { %v1576_v28 = vrot.slane %v1575_v43, 2 }
0x1161   :  { %v1577_v49 = vmax.f32 %v1575_v43, %v1576_v28 }
0x1163   :  { %v1578_v58 = vrot.slane %v1577_v49, 1 }
0x1165   :  { %v1579_v51 = vmax.f32 %v1577_v49, %v1578_v58 }
0x1167   :  { %v1857_v62 = vsel %vm1856_vm11, %v1441_v57, %v1579_v51 }
0x11c8   :  { %v1585_v60 = vpop.permute.xlu1 %1584 }
0x11ca   :  { %v1583_v34 = vpop.permute.xlu0 %1582 }
0x11cb   :  { %2349 = vmatprep.mubr.msk.f32.mxu0 %vm472_vm8, %v1583_v34 }
0x11cc   :  { %2350 = vmatmul.mubr.msk.f32.vlgmr.msra.gmra.mxu0 %vm472_vm8, %v1585_v60 }
0x11cd   :  { %2371 = vmatprep.mubr.msk.f32.mxu0 %vm2457_vm13, %v2453_v44 }
0x128c   :  { %v2351_v52 = vpop.f32.mrf.mxu0 }
0x128d   :  { %v1666_v5 = vadd.f32 %v2351_v52, %v1291_v48 }
0x128e   :  { %v1656_v7 = vpop.f32.mrf.mxu0 }
0x128f   :  { %2431 = vtanh.f32 %v1666_v5  ;;  %v1665_v9 = vadd.f32 %v1656_v7, %v1286_v2  ;;  %v1865_v2 = vld [vmem:[%s3326_s9 + $0x18] sm:$0xff]  ;;  %v1864_v5 = vld [vmem:[%s3326_s9 + $0x10] sm:$0xff]  ;;  %v1863_v7 = vld [vmem:[%s3326_s9 + $0x8] sm:$0xff] }
0x1290   :  { %2364 = vmatpush3.msra.mxu0 %v1865_v2 }
0x1291   :  { %2433 = vtanh.f32 %v1665_v9  ;;  %2365 = vmatprep.subr.mxu0 %v2453_v44  ;;  %v1862_v9 = vld [vmem:[%s3326_s9] sm:$0xff] }
0x1292   :  { %2366 = vmatpush3.msra.mxu0 %v1864_v5 }
0x1293   :  { %2367 = vmatprep.subr.mxu0 %v2453_v44 }
0x1294   :  { %2368 = vmatpush3.msra.mxu0 %v1863_v7 }
0x1295   :  { %2369 = vmatprep.subr.mxu0 %v2453_v44 }
0x1296   :  { %2370 = vmatpush3.msra.mxu0 %v1862_v9 }
0x129c   :  { %v2432_v13 = vpop.eup %2431 }
0x129d   :  { %v1670_v15 = vmul.f32 %v2432_v13, %v2964_v22 }
0x129e   :  { %v2434_v16 = vpop.eup %2433 }
0x129f   :  { %v1672_v23 = vadd.f32 %v1670_v15, %v2966_v24  ;;  %v1669_v26 = vmul.f32 %v2434_v16, %v2964_v22 }
0x12a1   :  { %1679 = vrot.lane.b32.xlu1 %v1672_v23, %s2455_s5  ;;  %v1671_v50 = vadd.f32 %v1669_v26, %v2966_v24  ;;  %v1674_v63 = vmul.f32 %v1672_v23, %v1556_v30 }
0x12a3   :  { %1677 = vrot.lane.b32.xlu0 %v1671_v50, %s2455_s5  ;;  %v1673_v32 = vmul.f32 %v1671_v50, %v1555_v39 }
0x1313   :  { %v1680_v59 = vpop.permute.xlu1 %1679 }
0x1314   :  { %v1684_v37 = vmul.f32 %v1680_v59, %v1672_v23 }
0x1315   :  { %v1678_v61 = vpop.permute.xlu0 %1677 }
0x1316   :  { %v1683_v54 = vmul.f32 %v1678_v61, %v1671_v50  ;;  %1689 = vrot.lane.b32.xlu1 %v1684_v37, %s2456_s23 }
0x1318   :  { %1687 = vrot.lane.b32.xlu0 %v1683_v54, %s2456_s23  ;;  %v16_v54 = vstv %s3327_s10 }
0x1319   :  { %17 = vst [vmem:[#allocation2] sm:$0x1] %v16_v54 }
0x1388   :  { %v1690_v56 = vpop.permute.xlu1 %1689 }
0x1389   :  { %v1694_v3 = vadd.f32 %v1690_v56, %v1674_v63 }
0x138a   :  { %v1688_v4 = vpop.permute.xlu0 %1687 }
0x138b   :  { %2435 = vtanh.f32 %v1694_v3  ;;  %v1693_v36 = vadd.f32 %v1688_v4, %v1673_v32 }
0x138d   :  { %2437 = vtanh.f32 %v1693_v36 }
0x1398   :  { %v2436_v12 = vpop.eup %2435 }
0x1399   :  { %1701 = vrot.lane.b32.xlu1 %v2436_v12, %s2455_s5 }
0x139a   :  { %v2438_v14 = vpop.eup %2437 }
0x139b   :  { %1699 = vrot.lane.b32.xlu0 %v2438_v14, %s2455_s5 }
0x140b   :  { %v1702_v17 = vpop.permute.xlu1 %1701 }
0x140c   :  { %v1706_v18 = vmul.f32 %v1702_v17, %v1672_v23 }
0x140d   :  { %v1700_v25 = vpop.permute.xlu0 %1699 }
0x140e   :  { %v1708_v29 = vsel %vm1308_vm9, %v1706_v18, -inf  ;;  %v1705_v30 = vmul.f32 %v1700_v25, %v1671_v50  ;;  %1722 = vrot.lane.b32.xlu1 %v1706_v18, %s2456_s23 }
0x140f   :  { %v1710_v33 = vsel %vm1432_vm10, %v1708_v29, -inf }
0x1410   :  { %v1709_v38 = vsel %vm1432_vm10, %v1705_v30, -inf  ;;  %1720 = vrot.lane.b32.xlu0 %v1705_v30, %s2456_s23 }
0x1411   :  { %v1711_v39 = vmax.f32 %v1709_v38, %v1710_v33 }
0x1413   :  { %v1712_v20 = vrot.slane %v1711_v39, 4 }
0x1415   :  { %v1713_v21 = vmax.f32 %v1711_v39, %v1712_v20 }
0x1417   :  { %v1714_v35 = vrot.slane %v1713_v21, 2 }
0x1419   :  { %v1715_v40 = vmax.f32 %v1713_v21, %v1714_v35 }
0x141b   :  { %v1716_v47 = vrot.slane %v1715_v40, 1 }
0x141d   :  { %v1717_v41 = vmax.f32 %v1715_v40, %v1716_v47 }
0x141f   :  { %v3272_v42 = vsel %vm1858_vm12, %v1857_v62, %v1717_v41 }
0x1480   :  { %v1723_v53 = vpop.permute.xlu1 %1722 }
0x1482   :  { %v1721_v0 = vpop.permute.xlu0 %1720 }
0x1483   :  { %2360 = vmatprep.mubr.msk.f32.mxu1 %vm472_vm8, %v1721_v0 }
0x1484   :  { %2361 = vmatmul.mubr.msk.f32.vlgmr.msra.gmra.mxu1 %vm472_vm8, %v1723_v53 }
0x1544   :  { %v2362_v1 = vpop.f32.mrf.mxu1 }
0x1545   :  { %v1804_v6 = vadd.f32 %v2362_v1, %v3201_v55 }
0x1546   :  { %v1794_v8 = vpop.f32.mrf.mxu1 }
0x1547   :  { %2439 = vtanh.f32 %v1804_v6  ;;  %v1803_v19 = vadd.f32 %v1794_v8, %v1296_v11 }
0x1549   :  { %2441 = vtanh.f32 %v1803_v19 }
0x1554   :  { %v2440_v27 = vpop.eup %2439 }
0x1555   :  { %v1808_v43 = vmul.f32 %v2440_v27, %v2964_v22 }
0x1556   :  { %v2442_v28 = vpop.eup %2441 }
0x1557   :  { %v1810_v31 = vadd.f32 %v1808_v43, %v2966_v24  ;;  %v1807_v49 = vmul.f32 %v2442_v28, %v2964_v22 }
0x1559   :  { %1817 = vrot.lane.b32.xlu0 %v1810_v31, %s2455_s5  ;;  %v1809_v58 = vadd.f32 %v1807_v49, %v2966_v24  ;;  %v1812_v62 = vmul.f32 %v1810_v31, %v1694_v3 }
0x155b   :  { %1815 = vrot.lane.b32.xlu1 %v1809_v58, %s2455_s5  ;;  %v1811_v46 = vmul.f32 %v1809_v58, %v1693_v36  ;;  %v2031_v36 = vld [vmem:[#allocation2] ss:$0 sm:$0xff] }
0x15cb   :  { %v1818_v10 = vpop.permute.xlu0 %1817 }
0x15cc   :  { %v1822_v55 = vmul.f32 %v1818_v10, %v1810_v31 }
0x15cd   :  { %v1816_v57 = vpop.permute.xlu1 %1815 }
0x15ce   :  { %v1821_v51 = vmul.f32 %v1816_v57, %v1809_v58  ;;  %1827 = vrot.lane.b32.xlu0 %v1822_v55, %s2456_s23 }
0x15d0   :  { %1825 = vrot.lane.b32.xlu1 %v1821_v51, %s2456_s23 }
0x1640   :  { %v1828_v34 = vpop.permute.xlu0 %1827 }
0x1641   :  { %v1832_v60 = vadd.f32 %v1828_v34, %v1812_v62 }
0x1642   :  { %v1826_v48 = vpop.permute.xlu1 %1825 }
0x1643   :  { %2443 = vtanh.f32 %v1832_v60  ;;  %v1831_v22 = vadd.f32 %v1826_v48, %v1811_v46 }
0x1645   :  { %2445 = vtanh.f32 %v1831_v22 }
0x1650   :  { %v2444_v52 = vpop.eup %2443 }
0x1651   :  { %1839 = vrot.lane.b32.xlu0 %v2444_v52, %s2455_s5 }
0x1652   :  { %v2446_v24 = vpop.eup %2445 }
0x1653   :  { %1837 = vrot.lane.b32.xlu1 %v2446_v24, %s2455_s5 }
0x16c3   :  { %v1840_v13 = vpop.permute.xlu0 %1839 }
0x16c4   :  { %v1844_v15 = vmul.f32 %v1840_v13, %v1810_v31 }
0x16c5   :  { %v1838_v16 = vpop.permute.xlu1 %1837 }
0x16c6   :  { %v1846_v23 = vsel %vm1308_vm9, %v1844_v15, -inf  ;;  %v1843_v26 = vmul.f32 %v1838_v16, %v1809_v58 }
0x16c7   :  { %v1848_v50 = vsel %vm1432_vm10, %v1846_v23, -inf }
0x16c8   :  { %v1847_v59 = vsel %vm1432_vm10, %v1843_v26, -inf }
0x16c9   :  { %v1849_v37 = vmax.f32 %v1847_v59, %v1848_v50 }
0x16cb   :  { %v1850_v61 = vrot.slane %v1849_v37, 4 }
0x16cd   :  { %v1851_v63 = vmax.f32 %v1849_v37, %v1850_v61 }
0x16cf   :  { %v1852_v44 = vrot.slane %v1851_v63, 2 }
0x16d1   :  { %v1853_v56 = vmax.f32 %v1851_v63, %v1852_v44 }
0x16d3   :  { %v1854_v3 = vrot.slane %v1853_v56, 1 }
0x16d5   :  { %v1855_v32 = vmax.f32 %v1853_v56, %v1854_v3 }
0x16d7   :  { %v1861_v45 = vsel %vm1860_vm14, %v3272_v42, %v1855_v32 }
0x16d8   :  { %1874 = vrot.lane.b32.xlu0 %v1861_v45, %s2456_s23 }
0x174a   :  { %v1875_v4 = vpop.permute.xlu0 %1874 }
0x174b   :  { %2372 = vmatmul.mubr.msk.f32.vlgmr.msra.gmra.mxu0 %vm472_vm8, %v1875_v4 }
0x180b   :  { %v1944_v12 = vpop.f32.mrf.mxu0 }
0x180c   :  { %v1945_v14 = vadd.f32 %v2031_v36, %v1944_v12 }
0x180d   :  { %v2373_v17 = vpop.f32.mrf.mxu0 }
0x180e   :  { %v2033_v18 = vmul.f32 -1.442695, %v1945_v14 }
0x1810   :  { %2447 = vpow2.f32 %v2033_v18 }
0x181d   :  { %v2448_v25 = vpop.eup %2447 }
0x181e   :  { %v1951_v29 = vadd.f32 1.0, %v2448_v25 }
0x1820   :  { %2449 = vrcp.f32 %v1951_v29 }
0x182d   :  { %v2450_v30 = vpop.eup %2449 }
0x182e   :  { %1955 = vst.msk [vmem:[%s3328_s11] sm:$0xf] %vm1954_vm15, %v2450_v30 }

</bundles_post_ra>
